<compile_context>
chip_gen: v5e
topology: v5e:2x2
jax: 0.10.0
libtpu: 0.0.40
codegen_flags: <defaults>
</compile_context>

<pallas_src>
from functools import partial

import jax
import jax.numpy as jnp
from jax.experimental import pallas as pl
from jax.experimental.pallas import tpu as pltpu

LANE = 128          # TPU lane width; every feature dimension is padded to this
BN_EPS = 1e-5


# ----------------------------------------------------------------------------
# Kernel 1: two GIN layers + per-graph mean, one graph-group per grid step
# ----------------------------------------------------------------------------

def gin_layers_kernel(a_ref, x_ref,
                      w01_ref, b01_ref, w02_ref, b02_ref, s0_ref, t0_ref,
                      w11_ref, b11_ref, s1_ref, t1_ref,
                      h_ref, hg_ref,
                      *, eps0, eps1, inv_n, graphs_per_block, n_nodes):
    """Processes `graphs_per_block` graphs packed block-diagonal (M nodes).

    MXU inputs bf16, accumulation f32, elementwise epilogue f32.
    Feature dims pre-padded to LANE=128 (padded channels stay exactly 0).
    """
    f32 = jnp.float32
    bf16 = jnp.bfloat16

    a = a_ref[0]                               # bf16 [M, M], block-diagonal
    x_bf = x_ref[...]                          # bf16 [M, LANE]
    x = x_bf.astype(f32)

    def linear(h_f32, w_ref, b_ref):
        y = jnp.dot(h_f32.astype(bf16), w_ref[...], preferred_element_type=f32)
        return y + b_ref[...]

    # ---- GIN layer 0: agg -> Lin -> ReLU -> Lin -> ReLU -> BN∘BN -> ReLU ---
    neigh = jnp.dot(a, x_bf, preferred_element_type=f32)
    agg = (1.0 + eps0) * x + neigh
    h = jnp.maximum(linear(agg, w01_ref, b01_ref), 0.0)
    h = jnp.maximum(linear(h, w02_ref, b02_ref), 0.0)
    h = jnp.maximum(h * s0_ref[...] + t0_ref[...], 0.0)   # folded BN_mlp∘BN_out
    # dropout: identity in eval mode

    # ---- GIN layer 1 (last): agg -> Lin -> ReLU -> BN∘BN -> ReLU -----------
    neigh = jnp.dot(a, h.astype(bf16), preferred_element_type=f32)
    agg = (1.0 + eps1) * h + neigh
    h = jnp.maximum(linear(agg, w11_ref, b11_ref), 0.0)
    h = jnp.maximum(h * s1_ref[...] + t1_ref[...], 0.0)
    h_ref[...] = h.astype(h_ref.dtype)                     # bf16 node features

    # ---- Per-graph mean over nodes (block-diagonal packing keeps graphs
    #      in disjoint 128-row slabs, so a reshape+sum is an exact per-graph
    #      reduction; all rows are real nodes -> no masking needed). ---------
    hg = jnp.sum(h.reshape(graphs_per_block, n_nodes, LANE), axis=1) * inv_n
    hg_ref[0] = hg                                          # f32 (GPB, LANE)


# ----------------------------------------------------------------------------
# Kernel 2: readout MLP applied once to all B graph means (M = B)
# ----------------------------------------------------------------------------

def readout_kernel(hg_ref, wr1_ref, br1_ref, wr2_ref, br2_ref, out_ref):
    f32 = jnp.float32
    bf16 = jnp.bfloat16
    hg = hg_ref[...]                                        # f32 (B, LANE)
    r = jnp.dot(hg.astype(bf16), wr1_ref[...], preferred_element_type=f32)
    r = jnp.maximum(r + br1_ref[...], 0.0)
    out = jnp.dot(r.astype(bf16), wr2_ref[...], preferred_element_type=f32)
    out_ref[...] = out + br2_ref[...]


# ----------------------------------------------------------------------------
# Wrapper
# ----------------------------------------------------------------------------

def _vmem():
    return pl.BlockSpec(memory_space=pltpu.MemorySpace.VMEM)


def gin_forward(A_groups, X_flat, p, *, n_nodes, graphs_per_block, out_features):
    """A_groups: [G, M, M] bf16 block-diagonal adjacency (M = GPB * n_nodes);
       X_flat:   [G*M, LANE] bf16 padded node features."""
    num_groups = A_groups.shape[0]
    M = graphs_per_block * n_nodes
    B = num_groups * graphs_per_block

    kernel = partial(gin_layers_kernel,
                     eps0=float(p["eps0"]), eps1=float(p["eps1"]),
                     inv_n=1.0 / float(n_nodes),
                     graphs_per_block=graphs_per_block, n_nodes=n_nodes)

    flops = num_groups * (2 * (2 * M * M * LANE)          # two aggregations
                          + 3 * (2 * M * LANE * LANE))    # three node linears
    bytes_accessed = (num_groups * (M * M * 2             # A (bf16)
                                    + 2 * M * LANE * 2    # X in + h out (bf16)
                                    + graphs_per_block * LANE * 4)
                      + 3 * LANE * LANE * 2               # resident weights
                      + 8 * LANE * 4)                     # biases/scales/shifts

    def wspec(shape):
        return pl.BlockSpec(shape, lambda i: (0,) * len(shape))

    h_flat, hg = pl.pallas_call(
        kernel,
        out_shape=(jax.ShapeDtypeStruct((num_groups * M, LANE), jnp.bfloat16),
                   jax.ShapeDtypeStruct((num_groups, graphs_per_block, LANE),
                                        jnp.float32)),
        grid=(num_groups,),
        in_specs=[
            pl.BlockSpec((1, M, M), lambda i: (i, 0, 0)),      # A (per group)
            pl.BlockSpec((M, LANE), lambda i: (i, 0)),         # X (per group)
            wspec((LANE, LANE)), wspec((1, LANE)),             # w01, b01
            wspec((LANE, LANE)), wspec((1, LANE)),             # w02, b02
            wspec((1, LANE)), wspec((1, LANE)),                # s0, t0
            wspec((LANE, LANE)), wspec((1, LANE)),             # w11, b11
            wspec((1, LANE)), wspec((1, LANE)),                # s1, t1
        ],
        out_specs=(pl.BlockSpec((M, LANE), lambda i: (i, 0)),
                   pl.BlockSpec((1, graphs_per_block, LANE),
                                lambda i: (i, 0, 0))),
        compiler_params=pltpu.CompilerParams(
            dimension_semantics=("parallel",)),
        cost_estimate=pl.CostEstimate(flops=flops, transcendentals=0,
                                      bytes_accessed=bytes_accessed),
    )(A_groups, X_flat,
      p["w01"], p["b01"], p["w02"], p["b02"], p["s0"], p["t0"],
      p["w11"], p["b11"], p["s1"], p["t1"])

    # Readout MLP once for all B graphs (M = B well-shaped matmuls).
    out_pad = pl.pallas_call(
        readout_kernel,
        out_shape=jax.ShapeDtypeStruct((B, LANE), jnp.float32),
        in_specs=[_vmem()] * 5,
        out_specs=_vmem(),
        cost_estimate=pl.CostEstimate(flops=2 * (2 * B * LANE * LANE),
                                      transcendentals=0,
                                      bytes_accessed=(B * 2 * LANE * 4
                                                      + 2 * LANE * LANE * 2)),
    )(hg.reshape(B, LANE), p["wr1"], p["br1"], p["wr2"], p["br2"])

    node_h = h_flat.reshape(B, n_nodes, LANE)[:, :, :out_features]
    return out_pad[:, :out_features], node_h


# ----------------------------------------------------------------------------
# Parameter construction (deterministic, synthetic) + packing/padding
# ----------------------------------------------------------------------------

def _linear_params(key, fan_in, fan_out):
    kw, kb = jax.random.split(key)
    bound = 1.0 / jnp.sqrt(fan_in)
    w = jax.random.uniform(kw, (fan_in, fan_out), jnp.float32, -bound, bound)
    b = jax.random.uniform(kb, (fan_out,), jnp.float32, -bound, bound)
    return w, b


def _bn_params(key, feat):
    kg, kb, km, kv = jax.random.split(key, 4)
    gamma = 1.0 + 0.1 * jax.random.normal(kg, (feat,), jnp.float32)
    beta = 0.1 * jax.random.normal(kb, (feat,), jnp.float32)
    rmean = 0.1 * jax.random.normal(km, (feat,), jnp.float32)
    rvar = 1.0 + 0.1 * jnp.abs(jax.random.normal(kv, (feat,), jnp.float32))
    return gamma, beta, rmean, rvar


def _bn_fold(bn):
    """Eval-mode BatchNorm1d -> per-feature (scale, shift)."""
    gamma, beta, rmean, rvar = bn
    s = gamma / jnp.sqrt(rvar + BN_EPS)
    t = beta - rmean * s
    return s, t


def _bn_compose(bn_a, bn_b):
    """Apply bn_a then bn_b (both eval mode) as one (scale, shift)."""
    s1, t1 = _bn_fold(bn_a)
    s2, t2 = _bn_fold(bn_b)
    return s1 * s2, t1 * s2 + t2


def make_gin_params(key, in_features, hidden_features, out_features):
    ks = jax.random.split(key, 12)
    p = {}
    # Layer 0: GINConv MLP = Linear(in,h), ReLU, Linear(h,h), ReLU, BN(h)
    p["w0_1"], p["b0_1"] = _linear_params(ks[0], in_features, hidden_features)
    p["w0_2"], p["b0_2"] = _linear_params(ks[1], hidden_features, hidden_features)
    p["bn0_mlp"] = _bn_params(ks[2], hidden_features)
    p["bn0_out"] = _bn_params(ks[3], hidden_features)
    p["eps0"] = 0.1
    # Layer 1 (last): GINConv MLP = Linear(h,out), ReLU, BN(out)
    p["w1_1"], p["b1_1"] = _linear_params(ks[4], hidden_features, out_features)
    p["bn1_mlp"] = _bn_params(ks[5], out_features)
    p["bn1_out"] = _bn_params(ks[6], out_features)
    p["eps1"] = 0.2
    # Readout: Linear(out,out), ReLU, Linear(out,out)
    p["wr1"], p["br1"] = _linear_params(ks[7], out_features, out_features)
    p["wr2"], p["br2"] = _linear_params(ks[8], out_features, out_features)
    return p


def _pad2(w):
    out = jnp.zeros((LANE, LANE), jnp.float32)
    return out.at[:w.shape[0], :w.shape[1]].set(w)


def _pad_row(v):
    out = jnp.zeros((1, LANE), jnp.float32)
    return out.at[0, :v.shape[0]].set(v)


def pack_params(p):
    """Fold BatchNorms, pad feature dims to LANE, cast matmul weights to bf16."""
    bf = jnp.bfloat16
    s0, t0 = _bn_compose(p["bn0_mlp"], p["bn0_out"])
    s1, t1 = _bn_compose(p["bn1_mlp"], p["bn1_out"])
    return dict(
        w01=_pad2(p["w0_1"]).astype(bf), b01=_pad_row(p["b0_1"]),
        w02=_pad2(p["w0_2"]).astype(bf), b02=_pad_row(p["b0_2"]),
        s0=_pad_row(s0), t0=_pad_row(t0),
        w11=_pad2(p["w1_1"]).astype(bf), b11=_pad_row(p["b1_1"]),
        s1=_pad_row(s1), t1=_pad_row(t1),
        wr1=_pad2(p["wr1"]).astype(bf), br1=_pad_row(p["br1"]),
        wr2=_pad2(p["wr2"]).astype(bf), br2=_pad_row(p["br2"]),
        eps0=p["eps0"], eps1=p["eps1"],
    )


# ----------------------------------------------------------------------------
# Main
# ----------------------------------------------------------------------------

if __name__ == "__main__":
    N_NODES = 128       # nodes per graph
    GPB = 2             # graphs packed block-diagonal per grid step -> M = 256
    NUM_GROUPS = 4      # grid length
    B = NUM_GROUPS * GPB
    M = GPB * N_NODES
    IN_FEAT = 16
    HIDDEN = 32
    OUT_FEAT = 32

    key = jax.random.PRNGKey(0)
    k_adj, k_feat, k_params = jax.random.split(key, 3)

    # Random directed adjacencies A[dst, src] (no self-loops), one per graph.
    A_all = (jax.random.uniform(k_adj, (B, N_NODES, N_NODES)) < 0.1
             ).astype(jnp.float32)
    A_all = A_all * (1.0 - jnp.eye(N_NODES, dtype=jnp.float32))

    # Pack GPB graphs block-diagonal per group: A_groups[g] is (M, M).
    A_groups = jnp.zeros((NUM_GROUPS, M, M), jnp.float32)
    for g in range(NUM_GROUPS):
        for j in range(GPB):
            b = g * GPB + j
            A_groups = A_groups.at[
                g, j * N_NODES:(j + 1) * N_NODES,
                j * N_NODES:(j + 1) * N_NODES].set(A_all[b])
    A_groups = A_groups.astype(jnp.bfloat16)   # 0/1 entries exact in bf16

    # Node features, zero-padded to lane width, bf16 (halves input DMA).
    X = jax.random.normal(k_feat, (B, N_NODES, IN_FEAT), jnp.float32)
    X_pad = jnp.zeros((B * N_NODES, LANE), jnp.float32)
    X_pad = X_pad.at[:, :IN_FEAT].set(X.reshape(B * N_NODES, IN_FEAT))
    X_flat = X_pad.astype(jnp.bfloat16)

    raw = make_gin_params(k_params, IN_FEAT, HIDDEN, OUT_FEAT)
    params = pack_params(raw)

    graph_out, node_h = jax.block_until_ready(
        gin_forward(A_groups, X_flat, params,
                    n_nodes=N_NODES, graphs_per_block=GPB,
                    out_features=OUT_FEAT))

    assert graph_out.shape == (B, OUT_FEAT)
    assert node_h.shape == (B, N_NODES, OUT_FEAT)
    assert jnp.all(jnp.isfinite(graph_out.astype(jnp.float32)))
    assert jnp.all(jnp.isfinite(node_h.astype(jnp.float32)))
    print("KERNEL_OK")
</pallas_src>

<mosaic_0001>
module attributes {stable_mosaic.version = 11 : i64} {
  func.func @gin_layers_kernel(%arg0: i32, %arg1: memref<1x256x256xbf16, #tpu.memory_space<vmem>>, %arg2: memref<256x128xbf16, #tpu.memory_space<vmem>>, %arg3: memref<128x128xbf16, #tpu.memory_space<vmem>>, %arg4: memref<1x128xf32, #tpu.memory_space<vmem>>, %arg5: memref<128x128xbf16, #tpu.memory_space<vmem>>, %arg6: memref<1x128xf32, #tpu.memory_space<vmem>>, %arg7: memref<1x128xf32, #tpu.memory_space<vmem>>, %arg8: memref<1x128xf32, #tpu.memory_space<vmem>>, %arg9: memref<128x128xbf16, #tpu.memory_space<vmem>>, %arg10: memref<1x128xf32, #tpu.memory_space<vmem>>, %arg11: memref<1x128xf32, #tpu.memory_space<vmem>>, %arg12: memref<1x128xf32, #tpu.memory_space<vmem>>, %arg13: memref<256x128xbf16, #tpu.memory_space<vmem>>, %arg14: memref<1x2x128xf32, #tpu.memory_space<vmem>>) attributes {dimension_semantics = [#tpu.dimension_semantics<parallel>], iteration_bounds = array<i64: 4>, scalar_prefetch = 0 : i64, scratch_operands = 0 : i64, tpu.core_type = #tpu.core_type<tc>, window_params = [{transform_indices = @transform_0, window_bounds = array<i64: 1, 256, 256>}, {transform_indices = @transform_1, window_bounds = array<i64: 256, 128>}, {pipeline_mode = #tpu.pipeline_mode<synchronous>, transform_indices = @transform_2, window_bounds = array<i64: 128, 128>}, {pipeline_mode = #tpu.pipeline_mode<synchronous>, transform_indices = @transform_3, window_bounds = array<i64: 1, 128>}, {pipeline_mode = #tpu.pipeline_mode<synchronous>, transform_indices = @transform_4, window_bounds = array<i64: 128, 128>}, {pipeline_mode = #tpu.pipeline_mode<synchronous>, transform_indices = @transform_5, window_bounds = array<i64: 1, 128>}, {pipeline_mode = #tpu.pipeline_mode<synchronous>, transform_indices = @transform_6, window_bounds = array<i64: 1, 128>}, {pipeline_mode = #tpu.pipeline_mode<synchronous>, transform_indices = @transform_7, window_bounds = array<i64: 1, 128>}, {pipeline_mode = #tpu.pipeline_mode<synchronous>, transform_indices = @transform_8, window_bounds = array<i64: 128, 128>}, {pipeline_mode = #tpu.pipeline_mode<synchronous>, transform_indices = @transform_9, window_bounds = array<i64: 1, 128>}, {pipeline_mode = #tpu.pipeline_mode<synchronous>, transform_indices = @transform_10, window_bounds = array<i64: 1, 128>}, {pipeline_mode = #tpu.pipeline_mode<synchronous>, transform_indices = @transform_11, window_bounds = array<i64: 1, 128>}, {transform_indices = @transform_12, window_bounds = array<i64: 256, 128>}, {transform_indices = @transform_13, window_bounds = array<i64: 1, 2, 128>}]} {
    %c0 = arith.constant 0 : index
    %c0_0 = arith.constant 0 : index
    %c0_1 = arith.constant 0 : index
    %0 = vector.load %arg1[%c0, %c0_0, %c0_1] : memref<1x256x256xbf16, #tpu.memory_space<vmem>>, vector<1x256x256xbf16>
    %1 = vector.shape_cast %0 : vector<1x256x256xbf16> to vector<256x256xbf16>
    %c0_2 = arith.constant 0 : index
    %c0_3 = arith.constant 0 : index
    %2 = vector.load %arg2[%c0_2, %c0_3] : memref<256x128xbf16, #tpu.memory_space<vmem>>, vector<256x128xbf16>
    %3 = arith.extf %2 : vector<256x128xbf16> to vector<256x128xf32>
    %cst = arith.constant dense<0.000000e+00> : vector<256x128xf32>
    %4 = tpu.matmul %1, %2, %cst {dimension_numbers = #tpu.dot_dimension_numbers<[1], [0], [0], [1], [0, 0, 1, 1], [], []>} : vector<256x256xbf16>, vector<256x128xbf16>, vector<256x128xf32> -> vector<256x128xf32>
    %cst_4 = arith.constant 1.100000e+00 : f32
    %5 = vector.broadcast %cst_4 : f32 to vector<256x128xf32>
    %6 = arith.mulf %5, %3 : vector<256x128xf32>
    %7 = arith.addf %6, %4 : vector<256x128xf32>
    %8 = arith.truncf %7 : vector<256x128xf32> to vector<256x128xbf16>
    %c0_5 = arith.constant 0 : index
    %c0_6 = arith.constant 0 : index
    %9 = vector.load %arg3[%c0_5, %c0_6] : memref<128x128xbf16, #tpu.memory_space<vmem>>, vector<128x128xbf16>
    %cst_7 = arith.constant dense<0.000000e+00> : vector<256x128xf32>
    %10 = tpu.matmul %8, %9, %cst_7 {dimension_numbers = #tpu.dot_dimension_numbers<[1], [0], [0], [1], [0, 0, 1, 1], [], []>} : vector<256x128xbf16>, vector<128x128xbf16>, vector<256x128xf32> -> vector<256x128xf32>
    %c0_8 = arith.constant 0 : index
    %c0_9 = arith.constant 0 : index
    %11 = vector.load %arg4[%c0_8, %c0_9] : memref<1x128xf32, #tpu.memory_space<vmem>>, vector<1x128xf32>
    %12 = vector.broadcast %11 : vector<1x128xf32> to vector<256x128xf32>
    %13 = arith.addf %10, %12 : vector<256x128xf32>
    %cst_10 = arith.constant 0.000000e+00 : f32
    %14 = vector.broadcast %cst_10 : f32 to vector<256x128xf32>
    %15 = arith.maximumf %13, %14 : vector<256x128xf32>
    %16 = arith.truncf %15 : vector<256x128xf32> to vector<256x128xbf16>
    %c0_11 = arith.constant 0 : index
    %c0_12 = arith.constant 0 : index
    %17 = vector.load %arg5[%c0_11, %c0_12] : memref<128x128xbf16, #tpu.memory_space<vmem>>, vector<128x128xbf16>
    %cst_13 = arith.constant dense<0.000000e+00> : vector<256x128xf32>
    %18 = tpu.matmul %16, %17, %cst_13 {dimension_numbers = #tpu.dot_dimension_numbers<[1], [0], [0], [1], [0, 0, 1, 1], [], []>} : vector<256x128xbf16>, vector<128x128xbf16>, vector<256x128xf32> -> vector<256x128xf32>
    %c0_14 = arith.constant 0 : index
    %c0_15 = arith.constant 0 : index
    %19 = vector.load %arg6[%c0_14, %c0_15] : memref<1x128xf32, #tpu.memory_space<vmem>>, vector<1x128xf32>
    %20 = vector.broadcast %19 : vector<1x128xf32> to vector<256x128xf32>
    %21 = arith.addf %18, %20 : vector<256x128xf32>
    %cst_16 = arith.constant 0.000000e+00 : f32
    %22 = vector.broadcast %cst_16 : f32 to vector<256x128xf32>
    %23 = arith.maximumf %21, %22 : vector<256x128xf32>
    %c0_17 = arith.constant 0 : index
    %c0_18 = arith.constant 0 : index
    %24 = vector.load %arg7[%c0_17, %c0_18] : memref<1x128xf32, #tpu.memory_space<vmem>>, vector<1x128xf32>
    %25 = vector.broadcast %24 : vector<1x128xf32> to vector<256x128xf32>
    %26 = arith.mulf %23, %25 : vector<256x128xf32>
    %c0_19 = arith.constant 0 : index
    %c0_20 = arith.constant 0 : index
    %27 = vector.load %arg8[%c0_19, %c0_20] : memref<1x128xf32, #tpu.memory_space<vmem>>, vector<1x128xf32>
    %28 = vector.broadcast %27 : vector<1x128xf32> to vector<256x128xf32>
    %29 = arith.addf %26, %28 : vector<256x128xf32>
    %cst_21 = arith.constant 0.000000e+00 : f32
    %30 = vector.broadcast %cst_21 : f32 to vector<256x128xf32>
    %31 = arith.maximumf %29, %30 : vector<256x128xf32>
    %32 = arith.truncf %31 : vector<256x128xf32> to vector<256x128xbf16>
    %cst_22 = arith.constant dense<0.000000e+00> : vector<256x128xf32>
    %33 = tpu.matmul %1, %32, %cst_22 {dimension_numbers = #tpu.dot_dimension_numbers<[1], [0], [0], [1], [0, 0, 1, 1], [], []>} : vector<256x256xbf16>, vector<256x128xbf16>, vector<256x128xf32> -> vector<256x128xf32>
    %cst_23 = arith.constant 1.200000e+00 : f32
    %34 = vector.broadcast %cst_23 : f32 to vector<256x128xf32>
    %35 = arith.mulf %34, %31 : vector<256x128xf32>
    %36 = arith.addf %35, %33 : vector<256x128xf32>
    %37 = arith.truncf %36 : vector<256x128xf32> to vector<256x128xbf16>
    %c0_24 = arith.constant 0 : index
    %c0_25 = arith.constant 0 : index
    %38 = vector.load %arg9[%c0_24, %c0_25] : memref<128x128xbf16, #tpu.memory_space<vmem>>, vector<128x128xbf16>
    %cst_26 = arith.constant dense<0.000000e+00> : vector<256x128xf32>
    %39 = tpu.matmul %37, %38, %cst_26 {dimension_numbers = #tpu.dot_dimension_numbers<[1], [0], [0], [1], [0, 0, 1, 1], [], []>} : vector<256x128xbf16>, vector<128x128xbf16>, vector<256x128xf32> -> vector<256x128xf32>
    %c0_27 = arith.constant 0 : index
    %c0_28 = arith.constant 0 : index
    %40 = vector.load %arg10[%c0_27, %c0_28] : memref<1x128xf32, #tpu.memory_space<vmem>>, vector<1x128xf32>
    %41 = vector.broadcast %40 : vector<1x128xf32> to vector<256x128xf32>
    %42 = arith.addf %39, %41 : vector<256x128xf32>
    %cst_29 = arith.constant 0.000000e+00 : f32
    %43 = vector.broadcast %cst_29 : f32 to vector<256x128xf32>
    %44 = arith.maximumf %42, %43 : vector<256x128xf32>
    %c0_30 = arith.constant 0 : index
    %c0_31 = arith.constant 0 : index
    %45 = vector.load %arg11[%c0_30, %c0_31] : memref<1x128xf32, #tpu.memory_space<vmem>>, vector<1x128xf32>
    %46 = vector.broadcast %45 : vector<1x128xf32> to vector<256x128xf32>
    %47 = arith.mulf %44, %46 : vector<256x128xf32>
    %c0_32 = arith.constant 0 : index
    %c0_33 = arith.constant 0 : index
    %48 = vector.load %arg12[%c0_32, %c0_33] : memref<1x128xf32, #tpu.memory_space<vmem>>, vector<1x128xf32>
    %49 = vector.broadcast %48 : vector<1x128xf32> to vector<256x128xf32>
    %50 = arith.addf %47, %49 : vector<256x128xf32>
    %cst_34 = arith.constant 0.000000e+00 : f32
    %51 = vector.broadcast %cst_34 : f32 to vector<256x128xf32>
    %52 = arith.maximumf %50, %51 : vector<256x128xf32>
    %53 = arith.truncf %52 : vector<256x128xf32> to vector<256x128xbf16>
    %c0_35 = arith.constant 0 : index
    %c0_36 = arith.constant 0 : index
    %54 = vector.load %arg13[%c0_35, %c0_36] : memref<256x128xbf16, #tpu.memory_space<vmem>>, vector<256x128xbf16>
    tpu.vector_store %arg13[%c0_35, %c0_36], %53 {strides = array<i32>} : memref<256x128xbf16, #tpu.memory_space<vmem>>, vector<256x128xbf16>,
    %55 = vector.shape_cast %52 : vector<256x128xf32> to vector<2x128x128xf32>
    %cst_37 = arith.constant dense<0.000000e+00> : vector<2x128xf32>
    %56 = vector.multi_reduction <add>, %55, %cst_37 [1] : vector<2x128x128xf32> to vector<2x128xf32>
    %cst_38 = arith.constant 7.812500e-03 : f32
    %57 = vector.broadcast %cst_38 : f32 to vector<2x128xf32>
    %58 = arith.mulf %56, %57 : vector<2x128xf32>
    %c0_39 = arith.constant 0 : index
    %c0_40 = arith.constant 0 : index
    %c0_41 = arith.constant 0 : index
    %59 = vector.load %arg14[%c0_39, %c0_40, %c0_41] : memref<1x2x128xf32, #tpu.memory_space<vmem>>, vector<1x2x128xf32>
    %60 = vector.shape_cast %59 : vector<1x2x128xf32> to vector<2x128xf32>
    %61 = vector.shape_cast %58 : vector<2x128xf32> to vector<1x2x128xf32>
    tpu.vector_store %arg14[%c0_39, %c0_40, %c0_41], %61 {strides = array<i32>} : memref<1x2x128xf32, #tpu.memory_space<vmem>>, vector<1x2x128xf32>,
    return
  }
  func.func @transform_0(%arg0: i32) -> (i32, i32, i32) {
    %c0_i32 = arith.constant 0 : i32
    %c0_i32_0 = arith.constant 0 : i32
    %c0_i32_1 = arith.constant 0 : i32
    return %arg0, %c0_i32, %c0_i32_0 : i32, i32, i32
  }
  func.func @transform_1(%arg0: i32) -> (i32, i32) {
    %c0_i32 = arith.constant 0 : i32
    %c0_i32_0 = arith.constant 0 : i32
    return %arg0, %c0_i32 : i32, i32
  }
  func.func @transform_2(%arg0: i32) -> (i32, i32) {
    %c0_i32 = arith.constant 0 : i32
    %c0_i32_0 = arith.constant 0 : i32
    %c0_i32_1 = arith.constant 0 : i32
    return %c0_i32, %c0_i32_0 : i32, i32
  }
  func.func @transform_3(%arg0: i32) -> (i32, i32) {
    %c0_i32 = arith.constant 0 : i32
    %c0_i32_0 = arith.constant 0 : i32
    %c0_i32_1 = arith.constant 0 : i32
    return %c0_i32, %c0_i32_0 : i32, i32
  }
  func.func @transform_4(%arg0: i32) -> (i32, i32) {
    %c0_i32 = arith.constant 0 : i32
    %c0_i32_0 = arith.constant 0 : i32
    %c0_i32_1 = arith.constant 0 : i32
    return %c0_i32, %c0_i32_0 : i32, i32
  }
  func.func @transform_5(%arg0: i32) -> (i32, i32) {
    %c0_i32 = arith.constant 0 : i32
    %c0_i32_0 = arith.constant 0 : i32
    %c0_i32_1 = arith.constant 0 : i32
    return %c0_i32, %c0_i32_0 : i32, i32
  }
  func.func @transform_6(%arg0: i32) -> (i32, i32) {
    %c0_i32 = arith.constant 0 : i32
    %c0_i32_0 = arith.constant 0 : i32
    %c0_i32_1 = arith.constant 0 : i32
    return %c0_i32, %c0_i32_0 : i32, i32
  }
  func.func @transform_7(%arg0: i32) -> (i32, i32) {
    %c0_i32 = arith.constant 0 : i32
    %c0_i32_0 = arith.constant 0 : i32
    %c0_i32_1 = arith.constant 0 : i32
    return %c0_i32, %c0_i32_0 : i32, i32
  }
  func.func @transform_8(%arg0: i32) -> (i32, i32) {
    %c0_i32 = arith.constant 0 : i32
    %c0_i32_0 = arith.constant 0 : i32
    %c0_i32_1 = arith.constant 0 : i32
    return %c0_i32, %c0_i32_0 : i32, i32
  }
  func.func @transform_9(%arg0: i32) -> (i32, i32) {
    %c0_i32 = arith.constant 0 : i32
    %c0_i32_0 = arith.constant 0 : i32
    %c0_i32_1 = arith.constant 0 : i32
    return %c0_i32, %c0_i32_0 : i32, i32
  }
  func.func @transform_10(%arg0: i32) -> (i32, i32) {
    %c0_i32 = arith.constant 0 : i32
    %c0_i32_0 = arith.constant 0 : i32
    %c0_i32_1 = arith.constant 0 : i32
    return %c0_i32, %c0_i32_0 : i32, i32
  }
  func.func @transform_11(%arg0: i32) -> (i32, i32) {
    %c0_i32 = arith.constant 0 : i32
    %c0_i32_0 = arith.constant 0 : i32
    %c0_i32_1 = arith.constant 0 : i32
    return %c0_i32, %c0_i32_0 : i32, i32
  }
  func.func @transform_12(%arg0: i32) -> (i32, i32) {
    %c0_i32 = arith.constant 0 : i32
    %c0_i32_0 = arith.constant 0 : i32
    return %arg0, %c0_i32 : i32, i32
  }
  func.func @transform_13(%arg0: i32) -> (i32, i32, i32) {
    %c0_i32 = arith.constant 0 : i32
    %c0_i32_0 = arith.constant 0 : i32
    %c0_i32_1 = arith.constant 0 : i32
    return %arg0, %c0_i32, %c0_i32_0 : i32, i32, i32
  }
}

</mosaic_0001>

<bundles_post_ra>
// kernel: tpu_custom_call.1
= control target key start
LH: loop header
LB: loop body
LE: loop exit
PB: predicated region body
PF: predicated region fallthrough
CT: control target
= control target key end

     0   :  { %s4522_s0 = inlined_call_operand.hbm [shape: bf16[4,256,256], index: 0, kind: input, shape index: {}]   ;;  %s4523_s1 = inlined_call_operand.hbm [shape: bf16[1024,128], index: 1, kind: input, shape index: {}]   ;;  %s4524_s2 = inlined_call_operand.hbm [shape: bf16[128,128], index: 2, kind: input, shape index: {}]   ;;  %s4525_s3 = inlined_call_operand.vmem [shape: f32[1,128], index: 3, kind: input, shape index: {}]   ;;  %s4526_s4 = inlined_call_operand.hbm [shape: bf16[128,128], index: 4, kind: input, shape index: {}]   ;;  %s4527_s5 = inlined_call_operand.vmem [shape: f32[1,128], index: 5, kind: input, shape index: {}]   ;;  %s4528_s6 = inlined_call_operand.vmem [shape: f32[1,128], index: 6, kind: input, shape index: {}]   ;;  %s4529_s7 = inlined_call_operand.vmem [shape: f32[1,128], index: 7, kind: input, shape index: {}]   ;;  %s4530_s8 = inlined_call_operand.hbm [shape: bf16[128,128], index: 8, kind: input, shape index: {}]   ;;  %s4531_s9 = inlined_call_operand.vmem [shape: f32[1,128], index: 9, kind: input, shape index: {}]   ;;  %s4532_s10 = inlined_call_operand.vmem [shape: f32[1,128], index: 10, kind: input, shape index: {}]   ;;  %s4533_s11 = inlined_call_operand.vmem [shape: f32[1,128], index: 11, kind: input, shape index: {}]   ;;  %s4534_s12 = inlined_call_operand.hbm [shape: bf16[1024,128], index: 12, kind: output, shape index: {0}]   ;;  %s4535_s13 = inlined_call_operand.hbm [shape: f32[4,2,128], index: 13, kind: output, shape index: {1}]  }
   0x1   :  { %4584 = sst [smem:[#allocation39_spill]] %s4522_s0 }
   0x2   :  { %4585 = sst [smem:[#allocation40_spill]] %s4524_s2 }
   0x3   :  { %4586 = sst [smem:[#allocation41_spill]] %s4526_s4 }
   0x4   :  { %4587 = sst [smem:[#allocation42_spill]] %s4530_s8 }
   0x5   :  { %4588 = sst [smem:[#allocation43_spill]] %s4533_s11 }
   0x6   :  { %4589 = sst [smem:[#allocation44_spill]] %s4534_s12 }
   0x7   :  { %4590 = sst [smem:[#allocation45_spill]] %s4535_s13 }
   0x8   :  { %19 = vsyncpa [#allocation3], 0 }
   0x9   :  { %21 = vsyncpa [#allocation3 + $0x1], 0 }
   0xa   :  { %22 = vsyncpa [#allocation6], 0 }
   0xb   :  { %24 = vsyncpa [#allocation6 + $0x1], 0 }
   0xc   :  { %25 = vsyncpa [#allocation9], 0 }
   0xd   :  { %26 = vsyncpa [#allocation4], 0 }
   0xe   :  { %28 = vsyncpa [#allocation4 + $0x1], 0 }
   0xf   :  { %29 = vsyncpa [#allocation13], 0 }
  0x10   :  { %31 = vsyncpa [#allocation13 + $0x1], 0  ;;  %s3496_s25 = smov 0   ;;  %s3498_s26 = smov 0  }
  0x11   :  { %s3500_s27 = smov 0   ;;  %s3502_s28 = smov 0  }
  0x12 LB: > { %4591 = sst [smem:[#allocation20_spill]] %s3403_s25  ;;  %s3517_s29 = sadd.s32 4294967295, %s3415_s28   ;;  %s3415_s28 = sphi %s3502_s28, %s4665_s28   ;;  %s3411_s27 = sphi %s3500_s27, %s4667_s27   ;;  %s3407_s26 = sphi %s3498_s26, %s4669_s26   ;;  %s3403_s25 = sphi %s3496_s25, %s4668_s25  }
  0x13   : > { %4592 = sst [smem:[#allocation21_spill]] %s3411_s27  ;;  %s2546_s30 = sadd.s32 4294967294, %s3415_s28  }
  0x14   : > { %p57_p0 = scmp.ne.s32.totalorder %s3407_s26, %s3403_s25  ;;  %p58_p1 = scmp.eq.s32.totalorder %s3517_s29, 0 }
  0x15   : > { %p317_p2 = scmp.eq.s32.totalorder %s3517_s29, 3  ;;  %p323_p3 = scmp.eq.s32.totalorder %s2546_s30, 3 }
  0x16   : > { %p3526_p4 = por %p58_p1, %p57_p0  ;;  %p2547_p5 = scmp.ge.s32.totalorder %s3415_s28, 1 }
  0x17   : > { %p3531_p6 = por %p323_p3, %p57_p0  ;;  %p356_p7 = scmp.lt.s32.totalorder %s3415_s28, 5 }
  0x18   : > { %s4596_s2 = sld [smem:[#allocation40_spill]]  ;;  %s3417_s20 = smov [#allocation7]  }
  0x19   : > { %s4594_s15 = scalar_select %p3531_p6, 1, 0 }
  0x1a   : > { %p3539_p8 = pnand %p2547_p5, %p356_p7  ;;  %s369_s21 = sshll.u32 %s3417_s20, 4  ;;  %s370_s21 = int_to_ptr.vmem [resolvable:$true] %s369_s21 }
  0x1b   : > { %4595 = sst [smem:[#allocation22_spill]] %s4594_s15  ;;  %s4537_s16 = smov 64  }
  0x1c   : > { %p3075_p9 = pneg %p3539_p8  ;;  %s4599_s4 = sld [smem:[#allocation41_spill]] }
  0x1d   : > { %s4538_s17 = smov 4   ;;  %s3420_s20 = smov [#allocation8]  }
  0x1e   : > { %s367_s18 = sshll.u32 %s4596_s2, 4  ;;  %p3547_p10 = pnand %p3075_p9, %p58_p1  ;;  %s368_s18 = int_to_ptr.hbm [resolvable:$true] %s367_s18 }
  0x1f   : > { %s386_s23 = sshll.u32 %s3420_s20, 4  ;;  %s4600_s8 = sld [smem:[#allocation42_spill]]  ;;  %s387_s23 = int_to_ptr.vmem [resolvable:$true] %s386_s23 }
  0x20   : > { %3078 = dma.hbm_to_vmem [thread:$0]  (!%p3547_p10), %s368_s18, 1024, %s370_s21, [#allocation6], %s4537_s16, %s4537_s16, %s4538_s17  }
  0x21   : > { %s3421_s18 = smov [#allocation10]   ;;  %s3568_s15 = sadd.s32 1, %s3415_s28  }
  0x22   : > { %s384_s30 = sshll.u32 %s4599_s4, 4  ;;  %s409_s21 = sshll.u32 %s3421_s18, 4  ;;  %s385_s30 = int_to_ptr.hbm [resolvable:$true] %s384_s30  ;;  %s410_s21 = int_to_ptr.vmem [resolvable:$true] %s409_s21 }
  0x23   : > { %3081 = dma.hbm_to_vmem [thread:$0]  (!%p3547_p10), %s385_s30, 1024, %s387_s23, [#allocation9], %s4537_s16, %s4537_s16, %s4538_s17  }
  0x24   : > { %4601 = sst [smem:[#allocation23_spill]] %s3568_s15  ;;  %s41_s2 = ssub.s32 %s3415_s28, %s3568_s15 }
  0x25   : > { %s407_s4 = sshll.u32 %s4600_s8, 4  ;;  %s44_s20 = sadd.s32 1, %s3411_s27  ;;  %s408_s4 = int_to_ptr.hbm [resolvable:$true] %s407_s4 }
  0x26   : > { %3084 = dma.hbm_to_vmem [thread:$0]  (!%p3547_p10), %s408_s4, 1024, %s410_s21, [#allocation9], %s4537_s16, %s4537_s16, %s4538_s17  }
  0x27   : > { %p42_p11 = scmp.eq.s32.totalorder %s41_s2, 0  ;;  %p51_p12 = scmp.ne.s32.totalorder %s3411_s27, %s3407_s26 }
  0x28   : > { %p52_p13 = scmp.eq.s32.totalorder %s3415_s28, 0  ;;  %p3102_p0 = scmp.lt.s32.totalorder %s3415_s28, 4 }
  0x29   : > { %s3583_s30 = scalar_select %p42_p11, %s3411_s27, %s44_s20  }
  0x2a   : > { %p53_p3 = por %p52_p13, %p51_p12  ;;  %p3587_p5 = por %p317_p2, %p51_p12 }
  0x2b   : > { %4602 = sst [smem:[#allocation24_spill]] %s3583_s30  ;;  %s3592_s22 = sand.u32 1, %s3411_s27  }
  0x2c   : > { %s4603_s23 = scalar_select %p3587_p5, 1, 0 }
  0x2d   : > { %s2861_s4 = sshll.u32 %s3415_s28, 8  ;;  %s2552_s24 = sshll.u32 %s3592_s22, 8 }
  0x2e   : > { %4604 = sst [smem:[#allocation25_spill]] %s4603_s23  ;;  %s436_s17 = scalar_lea.vmem [#allocation2], %s2552_s24 }
  0x2f   : > { %s4605_s0 = sld [smem:[#allocation39_spill]]  ;;  %s444_s20 = sshll.u32 %s436_s17, 4  ;;  %s445_s20 = int_to_ptr.vmem [resolvable:$true] %s444_s20 }
  0x30   : > { %p3601_p2 = pnand %p3102_p0, %p53_p3  ;;  %s454_s30 = sand.u32 1, %s3415_s28  }
  0x31   : > { %s433_s27 = scalar_lea.sflag [#allocation3], %s3592_s22 }
  0x32   : > { %p3249_p9 = pneg %p3601_p2 }
  0x35   : > { %s441_s2 = scalar_lea.hbm %s4605_s0, %s2861_s4  ;;  %s3252_s24 = scalar_lea.hbm %s4605_s0, 1024 }
  0x36   : > { %s442_s16 = sshll.u32 %s441_s2, 4  ;;  %s443_s16 = int_to_ptr.hbm [resolvable:$true] %s442_s16 }
  0x37   : > { %s3245_s15 = sshra.s32 %s443_s16, 4  ;;  %s3246_s15 = int_to_ptr.hbm [resolvable:$true] %s3245_s15 }
  0x38   : > { %s3247_s25 = scalar_lea.hbm %s3246_s15, 256  ;;  %p3253_p12 = scmp.lt.s32.totalorder %s3246_s15, %s4605_s0 }
  0x39   : > { %p3248_p7 = scmp.ne.s32.totalorder %s3246_s15, %s3247_s25  ;;  %p3254_p13 = scmp.lt.s32.totalorder %s3252_s24, %s3247_s25 }
  0x3b   : > { %p3250_p10 = pnand %p3249_p9, %p3248_p7  ;;  %p3255_p0 = por %p3254_p13, %p3253_p12 }
  0x3d   : > { %p3251_p11 = pneg %p3250_p10 }
  0x3f   : > { %p3256_p3 = pnand %p3255_p0, %p3251_p11 }
  0x41   : > { %3259 = shalt.err (!%p3256_p3)
}
  0x42   : > { %s3422_s2 = smov 128   ;;  %s3423_s13 = smov 8  }
  0x43   : > { %3088 = dma.hbm_to_vmem [thread:$0]  (!%p3601_p2), %s443_s16, 4096, %s445_s20, %s433_s27, %s3422_s2, %s3422_s2, %s3423_s13  }
  0x44   : > { %s2555_s23 = sshll.u32 %s3592_s22, 7  ;;  %s2862_s12 = sshll.u32 %s3415_s28, 7 }
  0x45   : > { %s463_s11 = scalar_lea.hbm %s4523_s1, %s2862_s12  ;;  %s458_s15 = scalar_lea.vmem [#allocation5], %s2555_s23 }
  0x46   : > { %s464_s18 = sshll.u32 %s463_s11, 4  ;;  %s466_s25 = sshll.u32 %s458_s15, 4  ;;  %s465_s18 = int_to_ptr.hbm [resolvable:$true] %s464_s18  ;;  %s467_s25 = int_to_ptr.vmem [resolvable:$true] %s466_s25 }
  0x47   : > { %s455_s24 = scalar_lea.sflag [#allocation6], %s454_s30  ;;  %s3275_s21 = sshra.s32 %s465_s18, 4  ;;  %s3276_s21 = int_to_ptr.hbm [resolvable:$true] %s3275_s21 }
  0x48   : > { %s3277_s0 = scalar_lea.hbm %s3276_s21, 128  ;;  %s3282_s16 = scalar_lea.hbm %s4523_s1, 512 }
  0x49   : > { %p3278_p7 = scmp.ne.s32.totalorder %s3276_s21, %s3277_s0  ;;  %p3283_p12 = scmp.lt.s32.totalorder %s3276_s21, %s4523_s1 }
  0x4a   : > { %p3284_p13 = scmp.lt.s32.totalorder %s3282_s16, %s3277_s0 }
  0x4b   : > { %p3280_p10 = pnand %p3278_p7, %p3249_p9 }
  0x4c   : > { %p3285_p0 = por %p3284_p13, %p3283_p12 }
  0x4d   : > { %p3281_p11 = pneg %p3280_p10 }
  0x4f   : > { %p3286_p3 = pnand %p3285_p0, %p3281_p11 }
  0x51   : > { %3289 = shalt.err (!%p3286_p3)
}
  0x52   : > { %s4607_s11 = smov 4   ;;  %s4608_s30 = smov 64  }
  0x53   : > { %3091 = dma.hbm_to_vmem [thread:$0]  (!%p3601_p2), %s465_s18, 2048, %s467_s25, %s455_s24, %s4608_s30, %s4608_s30, %s4607_s11  }
  0x54   : > { %478 = sbr.rel (%p3539_p8) target bundleno = 1399 (0x577), region = 68 }
  0x59   : > { %s3642_s23 = sand.u32 1, %s3407_s26  }
  0x5a   : > { %s2559_s20 = sshll.u32 %s3642_s23, 8  ;;  %s481_s0 = scalar_lea.sflag [#allocation3], %s3642_s23 }
  0x5b   : > { %s3646_s2 = scalar_lea.vmem [#allocation2], %s2559_s20 }
  0x5c   : > { %3378 = dma.done.wait (%p3526_p4), %s481_s0, 4096  }
  0x5d   : > { %3380 = vsyncadd (%p3526_p4), %s481_s0, 4294963200  ;;  %s490_s8 = sand.u32 1, %s3517_s29   ;;  %s2560_s19 = sshll.u32 %s3642_s23, 7 }
  0x5e   : > { %s491_s17 = scalar_lea.sflag [#allocation6], %s490_s8  ;;  %s3656_s4 = scalar_lea.vmem [#allocation5], %s2560_s19 }
  0x5f   : > { %3382 = dma.done.wait (%p3526_p4), %s491_s17, 2048  }
  0x60   : > { %3384 = vsyncadd (%p3526_p4), %s491_s17, 4294965248 }
  0x61   : > { %3386 = dma.done.wait (%p58_p1), [#allocation6], 1024  }
  0x62   : > { %3388 = vsyncadd (%p58_p1), [#allocation6], 4294966272 }
  0x63   : > { %3390 = dma.done.wait (%p58_p1), [#allocation9], 2048  }
  0x64   : > { %3392 = vsyncadd (%p58_p1), [#allocation9], 4294965248  ;;  %v2902_v0 = vld [vmem:[%s3656_s4 + $0x38] sm:$0xff]  ;;  %v2901_v2 = vld [vmem:[%s3656_s4 + $0x30] sm:$0xff]  ;;  %s4651_s0 = sld [smem:[#allocation43_spill]]  ;;  %s2935_s8 = sshll.u32 %s3517_s29, 7 }
  0x65   : > { %v2910_v1 = vld [vmem:[%s3656_s4 + $0x78] sm:$0xff]  ;;  %917 = vmatpush.bf16.msra.mxu0 %v2902_v0  ;;  %3031 = vmatpush.bf16.msra.mxu3 %v2902_v0  ;;  %v2909_v3 = vld [vmem:[%s3656_s4 + $0x70] sm:$0xff]  ;;  %v2900_v4 = vld [vmem:[%s3656_s4 + $0x28] sm:$0xff]  ;;  %s2355_s24 = scalar_lea.sflag [#allocation4], %s3642_s23 }
  0x66   : > { %1006 = vmatpush.bf16.msra.mxu1 %v2910_v1  ;;  %v2908_v5 = vld [vmem:[%s3656_s4 + $0x68] sm:$0xff]  ;;  %v2899_v6 = vld [vmem:[%s3656_s4 + $0x20] sm:$0xff]  ;;  %v2898_v8 = vld [vmem:[%s3656_s4 + $0x18] sm:$0xff] }
  0x67   : > { %v2907_v7 = vld [vmem:[%s3656_s4 + $0x60] sm:$0xff]  ;;  %v2906_v9 = vld [vmem:[%s3656_s4 + $0x58] sm:$0xff]  ;;  %v2897_v10 = vld [vmem:[%s3656_s4 + $0x10] sm:$0xff] }
  0x68   : > { %v2905_v11 = vld [vmem:[%s3656_s4 + $0x50] sm:$0xff]  ;;  %v2896_v12 = vld [vmem:[%s3656_s4 + $0x8] sm:$0xff]  ;;  %v2895_v14 = vld [vmem:[%s3656_s4] sm:$0xff] }
  0x69   : > { %918 = vmatpush.bf16.msra.mxu0 %v2901_v2  ;;  %3032 = vmatpush.bf16.msra.mxu3 %v2901_v2  ;;  %v2904_v13 = vld [vmem:[%s3656_s4 + $0x48] sm:$0xff]  ;;  %v2568_v15 = vld [vmem:[%s3646_s2] sm:$0xf]  ;;  %v2863_v20 = vld [vmem:[%s3646_s2 + $0x4] sm:$0xf] }
  0x6a   : > { %1007 = vmatpush.bf16.msra.mxu1 %v2909_v3  ;;  %v2864_v16 = vld [vmem:[%s3646_s2 + $0x4] sm:$0xf0]  ;;  %v2664_v17 = vld [vmem:[%s3646_s2 + $0xc0] sm:$0xf]  ;;  %v2570_v21 = vld [vmem:[%s3646_s2 + $0x8] sm:$0xf0] }
  0x6b   : > { %v2888_v18 = vld [vmem:[%s3646_s2 + $0xc4] sm:$0xf0]  ;;  %v2903_v19 = vld [vmem:[%s3656_s4 + $0x40] sm:$0xff]  ;;  %v3692_v22 = vor.u32 %v2864_v16, %v2568_v15  ;;  %v3696_v24 = vor.u32 %v2863_v20, %v2570_v21  ;;  %v2576_v25 = vld [vmem:[%s3646_s2 + $0x10] sm:$0xf] }
  0x6c   : > { %v3694_v23 = vor.u32 %v2888_v18, %v2664_v17  ;;  %v2866_v26 = vld [vmem:[%s3646_s2 + $0x14] sm:$0xf0]  ;;  %v2672_v27 = vld [vmem:[%s3646_s2 + $0xd0] sm:$0xf]  ;;  %v2865_v29 = vld [vmem:[%s3646_s2 + $0x14] sm:$0xf] }
  0x6d   : > { %919 = vmatpush.bf16.msra.mxu0 %v2900_v4  ;;  %3033 = vmatpush.bf16.msra.mxu3 %v2900_v4  ;;  %v2890_v28 = vld [vmem:[%s3646_s2 + $0xd4] sm:$0xf0]  ;;  %v2578_v30 = vld [vmem:[%s3646_s2 + $0x18] sm:$0xf0]  ;;  %v3707_v31 = vor.u32 %v2866_v26, %v2576_v25  ;;  %v2584_v34 = vld [vmem:[%s3646_s2 + $0x20] sm:$0xf] }
  0x6e   : > { %1008 = vmatpush.bf16.msra.mxu1 %v2908_v5  ;;  %v3709_v32 = vor.u32 %v2890_v28, %v2672_v27  ;;  %v3711_v33 = vor.u32 %v2865_v29, %v2578_v30  ;;  %v2868_v35 = vld [vmem:[%s3646_s2 + $0x24] sm:$0xf0]  ;;  %v2680_v36 = vld [vmem:[%s3646_s2 + $0xe0] sm:$0xf]  ;;  %v2867_v38 = vld [vmem:[%s3646_s2 + $0x24] sm:$0xf] }
  0x6f   : > { %v2892_v37 = vld [vmem:[%s3646_s2 + $0xe4] sm:$0xf0]  ;;  %v2586_v39 = vld [vmem:[%s3646_s2 + $0x28] sm:$0xf0]  ;;  %v3722_v40 = vor.u32 %v2868_v35, %v2584_v34  ;;  %v2592_v43 = vld [vmem:[%s3646_s2 + $0x30] sm:$0xf] }
  0x70   : > { %v3724_v41 = vor.u32 %v2892_v37, %v2680_v36  ;;  %v3726_v42 = vor.u32 %v2867_v38, %v2586_v39  ;;  %v2870_v44 = vld [vmem:[%s3646_s2 + $0x34] sm:$0xf0]  ;;  %v2688_v45 = vld [vmem:[%s3646_s2 + $0xf0] sm:$0xf]  ;;  %v2869_v47 = vld [vmem:[%s3646_s2 + $0x34] sm:$0xf] }
  0x71   : > { %920 = vmatpush.bf16.msra.mxu0 %v2899_v6  ;;  %3034 = vmatpush.bf16.msra.mxu3 %v2899_v6  ;;  %v2894_v46 = vld [vmem:[%s3646_s2 + $0xf4] sm:$0xf0]  ;;  %v2594_v48 = vld [vmem:[%s3646_s2 + $0x38] sm:$0xf0]  ;;  %v3737_v49 = vor.u32 %v2870_v44, %v2592_v43  ;;  %v2600_v52 = vld [vmem:[%s3646_s2 + $0x40] sm:$0xf] }
  0x72   : > { %1009 = vmatpush.bf16.msra.mxu1 %v2907_v7  ;;  %v3739_v50 = vor.u32 %v2894_v46, %v2688_v45  ;;  %v3741_v51 = vor.u32 %v2869_v47, %v2594_v48  ;;  %v2872_v53 = vld [vmem:[%s3646_s2 + $0x44] sm:$0xf0]  ;;  %v2887_v54 = vld [vmem:[%s3646_s2 + $0xc4] sm:$0xf]  ;;  %v2666_v55 = vld [vmem:[%s3646_s2 + $0xc8] sm:$0xf0] }
  0x73   : > { %v2871_v56 = vld [vmem:[%s3646_s2 + $0x44] sm:$0xf]  ;;  %v2602_v57 = vld [vmem:[%s3646_s2 + $0x48] sm:$0xf0]  ;;  %v3752_v58 = vor.u32 %v2872_v53, %v2600_v52  ;;  %v3754_v59 = vor.u32 %v2887_v54, %v2666_v55  ;;  %v2918_v61 = vld [vmem:[#allocation7 + $0x38] sm:$0xff] }
  0x74   : > { %v3756_v60 = vor.u32 %v2871_v56, %v2602_v57  ;;  %1243 = vmatpush.bf16.msra.mxu2 %v2918_v61  ;;  %v2608_v62 = vld [vmem:[%s3646_s2 + $0x50] sm:$0xf]  ;;  %v2874_v63 = vld [vmem:[%s3646_s2 + $0x54] sm:$0xf0]  ;;  %v2889_v0 = vld [vmem:[%s3646_s2 + $0xd4] sm:$0xf] }
  0x75   : > { %921 = vmatpush.bf16.msra.mxu0 %v2898_v8  ;;  %3035 = vmatpush.bf16.msra.mxu3 %v2898_v8  ;;  %4609 = vst [vmem:[#allocation26_spill] sm:$0xff] %v3754_v59  ;;  %v2873_v2 = vld [vmem:[%s3646_s2 + $0x54] sm:$0xf]  ;;  %v3767_v4 = vor.u32 %v2874_v63, %v2608_v62  ;;  %v2916_v8 = vld [vmem:[#allocation7 + $0x28] sm:$0xff]  ;;  %v2914_v18 = vld [vmem:[#allocation7 + $0x18] sm:$0xff] }
  0x76   : > { %1010 = vmatpush.bf16.msra.mxu1 %v2906_v9  ;;  %v2618_v15 = vld [vmem:[%s3646_s2 + $0x68] sm:$0xf0]  ;;  %v2913_v20 = vld [vmem:[#allocation7 + $0x10] sm:$0xff]  ;;  %v2911_v25 = vld [vmem:[#allocation7] sm:$0xff] }
  0x77   : > { %v2912_v21 = vld [vmem:[#allocation7 + $0x8] sm:$0xff]  ;;  %v2624_v26 = vld [vmem:[%s3646_s2 + $0x70] sm:$0xf]  ;;  %v2878_v27 = vld [vmem:[%s3646_s2 + $0x74] sm:$0xf0] }
  0x78   : > { %v2893_v28 = vld [vmem:[%s3646_s2 + $0xf4] sm:$0xf]  ;;  %v2690_v29 = vld [vmem:[%s3646_s2 + $0xf8] sm:$0xf0]  ;;  %v3797_v35 = vor.u32 %v2878_v27, %v2624_v26  ;;  %v2632_v38 = vld [vmem:[%s3646_s2 + $0x80] sm:$0xf] }
  0x79   : > { %922 = vmatpush.bf16.msra.mxu0 %v2897_v10  ;;  %3036 = vmatpush.bf16.msra.mxu3 %v2897_v10  ;;  %v2616_v10 = vld [vmem:[%s3646_s2 + $0x60] sm:$0xf]  ;;  %v2877_v30 = vld [vmem:[%s3646_s2 + $0x74] sm:$0xf]  ;;  %v2626_v34 = vld [vmem:[%s3646_s2 + $0x78] sm:$0xf0]  ;;  %v3799_v36 = vor.u32 %v2893_v28, %v2690_v29 }
  0x7a   : > { %1011 = vmatpush.bf16.msra.mxu1 %v2905_v11  ;;  %v3801_v37 = vor.u32 %v2877_v30, %v2626_v34  ;;  %v2880_v39 = vld [vmem:[%s3646_s2 + $0x84] sm:$0xf0]  ;;  %v2879_v43 = vld [vmem:[%s3646_s2 + $0x84] sm:$0xf]  ;;  %v2634_v44 = vld [vmem:[%s3646_s2 + $0x88] sm:$0xf0] }
  0x7b   : > { %4612 = vst [vmem:[#allocation29_spill] sm:$0xff] %v3799_v36  ;;  %v3810_v45 = vor.u32 %v2880_v39, %v2632_v38  ;;  %v3812_v47 = vor.u32 %v2879_v43, %v2634_v44  ;;  %v597_v48 = vld [vmem:[%s3656_s4] sm:$0xff]   ;;  %v2884_v44 = vld [vmem:[%s3646_s2 + $0xa4] sm:$0xf0] }
  0x7c   : > { %v629_v53 = vunpack.c.l.bf16 %v597_v48  ;;  %v630_v54 = vunpack.c.h.bf16 %v597_v48  ;;  %v2648_v43 = vld [vmem:[%s3646_s2 + $0xa0] sm:$0xf]  ;;  %v2650_v48 = vld [vmem:[%s3646_s2 + $0xa8] sm:$0xf0] }
  0x7d   : > { %923 = vmatpush.bf16.msra.mxu0 %v2896_v12  ;;  %3037 = vmatpush.bf16.msra.mxu3 %v2896_v12  ;;  %v2891_v12 = vld [vmem:[%s3646_s2 + $0xe4] sm:$0xf] }
  0x7e   : > { %1012 = vmatpush.bf16.msra.mxu1 %v2904_v13  ;;  %v1095_v57 = vmul.f32 1.1, %v629_v53  ;;  %v1096_v62 = vmul.f32 1.1, %v630_v54  ;;  %v3840_v54 = vor.u32 %v2884_v44, %v2648_v43 }
  0x81   : > { %924 = vmatpush.bf16.msra.mxu0 %v2895_v14  ;;  %3038 = vmatpush.bf16.msra.mxu3 %v2895_v14  ;;  %v2875_v14 = vld [vmem:[%s3646_s2 + $0x64] sm:$0xf] }
  0x82   : > { %1013 = vmatpush.bf16.msra.mxu1 %v2903_v19 }
  0x84   : > { %925 = vmatmul.bf16.vlgmr.msra.gmra.mxu0 %v3692_v22  ;;  %985 = vmatmul.bf16.vlgmr.msra.gmra.mxu3 %v3694_v23 }
  0x85   : > { %3039 = vmatpush.bf16.msrb.mxu3 %v2910_v1  ;;  %1014 = vmatmul.bf16.vlgmr.msra.gmra.mxu1 %v3696_v24  ;;  %v2674_v1 = vld [vmem:[%s3646_s2 + $0xd8] sm:$0xf0] }
  0x89   : > { %3040 = vmatpush.bf16.msrb.mxu3 %v2909_v3  ;;  %v2610_v3 = vld [vmem:[%s3646_s2 + $0x58] sm:$0xf0] }
  0x8a   : > { %v3771_v6 = vor.u32 %v2873_v2, %v2610_v3  ;;  %v2640_v3 = vld [vmem:[%s3646_s2 + $0x90] sm:$0xf] }
  0x8d   : > { %3041 = vmatpush.bf16.msrb.mxu3 %v2908_v5  ;;  %v3769_v5 = vor.u32 %v2889_v0, %v2674_v1 }
  0x8f   : > { %4610 = vst [vmem:[#allocation27_spill] sm:$0xff] %v3769_v5 }
  0x91   : > { %3042 = vmatpush.bf16.msrb.mxu3 %v2907_v7  ;;  %v2917_v7 = vld [vmem:[#allocation7 + $0x30] sm:$0xff] }
  0x92   : > { %1244 = vmatpush.bf16.msra.mxu2 %v2917_v7 }
  0x94   : > { %930 = vmatmul.bf16.gmra.mxu0 %v3707_v31  ;;  %990 = vmatmul.bf16.gmra.mxu3 %v3709_v32 }
  0x95   : > { %3043 = vmatpush.bf16.msrb.mxu3 %v2906_v9  ;;  %1019 = vmatmul.bf16.gmra.mxu1 %v3711_v33  ;;  %v2915_v9 = vld [vmem:[#allocation7 + $0x20] sm:$0xff] }
  0x96   : > { %1245 = vmatpush.bf16.msra.mxu2 %v2916_v8 }
  0x99   : > { %3044 = vmatpush.bf16.msrb.mxu3 %v2905_v11  ;;  %v2876_v11 = vld [vmem:[%s3646_s2 + $0x64] sm:$0xf0] }
  0x9a   : > { %1246 = vmatpush.bf16.msra.mxu2 %v2915_v9  ;;  %v3782_v16 = vor.u32 %v2876_v11, %v2616_v10 }
  0x9d   : > { %3045 = vmatpush.bf16.msrb.mxu3 %v2904_v13  ;;  %v2682_v13 = vld [vmem:[%s3646_s2 + $0xe8] sm:$0xf0] }
  0x9e   : > { %v3784_v17 = vor.u32 %v2891_v12, %v2682_v13  ;;  %1247 = vmatpush.bf16.msra.mxu2 %v2914_v18 }
  0xa0   : > { %4611 = vst [vmem:[#allocation28_spill] sm:$0xff] %v3784_v17 }
  0xa1   : > { %3046 = vmatpush.bf16.msrb.mxu3 %v2903_v19  ;;  %v3786_v19 = vor.u32 %v2875_v14, %v2618_v15  ;;  %v599_v15 = vld [vmem:[%s3656_s4 + $0x8] sm:$0xff]  }
  0xa2   : > { %1248 = vmatpush.bf16.msra.mxu2 %v2913_v20 }
  0xa4   : > { %935 = vmatmul.bf16.gmra.mxu0 %v3722_v40  ;;  %995 = vmatmul.bf16.gmra.mxu3 %v3724_v41 }
  0xa5   : > { %1024 = vmatmul.bf16.gmra.mxu1 %v3726_v42  ;;  %3047 = vmatpush.bf16.msra.mxu3 %v2918_v61 }
  0xa6   : > { %1249 = vmatpush.bf16.msra.mxu2 %v2912_v21 }
  0xa9   : > { %3048 = vmatpush.bf16.msra.mxu3 %v2917_v7  ;;  %v2882_v7 = vld [vmem:[%s3646_s2 + $0x94] sm:$0xf0] }
  0xaa   : > { %1250 = vmatpush.bf16.msra.mxu2 %v2911_v25  ;;  %v3825_v12 = vor.u32 %v2882_v7, %v2640_v3 }
  0xad   : > { %3049 = vmatpush.bf16.msra.mxu3 %v2916_v8  ;;  %v2881_v8 = vld [vmem:[%s3646_s2 + $0x94] sm:$0xf] }
  0xb1   : > { %3050 = vmatpush.bf16.msra.mxu3 %v2915_v9  ;;  %v2642_v9 = vld [vmem:[%s3646_s2 + $0x98] sm:$0xf0] }
  0xb2   : > { %v3827_v14 = vor.u32 %v2881_v8, %v2642_v9 }
  0xb4   : > { %940 = vmatmul.bf16.gmra.mxu0 %v3737_v49  ;;  %1000 = vmatmul.bf16.gmra.mxu3 %v3739_v50 }
  0xb5   : > { %1029 = vmatmul.bf16.gmra.mxu1 %v3741_v51  ;;  %3051 = vmatpush.bf16.msra.mxu3 %v2914_v18 }
  0xb9   : > { %3052 = vmatpush.bf16.msra.mxu3 %v2913_v20  ;;  %v631_v20 = vunpack.c.l.bf16 %v599_v15 }
  0xbb   : > { %v1097_v27 = vmul.f32 1.1, %v631_v20  ;;  %v2886_v20 = vld [vmem:[%s3646_s2 + $0xb4] sm:$0xf0] }
  0xbd   : > { %3053 = vmatpush.bf16.msra.mxu3 %v2912_v21  ;;  %v632_v21 = vunpack.c.h.bf16 %v599_v15 }
  0xbf   : > { %v1098_v29 = vmul.f32 1.1, %v632_v21  ;;  %v2885_v21 = vld [vmem:[%s3646_s2 + $0xb4] sm:$0xf] }
  0xc1   : > { %3054 = vmatpush.bf16.msra.mxu3 %v2911_v25 }
  0xc4   : > { %945 = vmatmul.bf16.gmra.mxu0 %v3752_v58  ;;  %1074 = vmatmul.bf16.vlgmr.msrb.gmra.mxu3 %v3754_v59 }
  0xc5   : > { %1034 = vmatmul.bf16.gmra.mxu1 %v3756_v60 }
  0xd4   : > { %950 = vmatmul.bf16.gmra.mxu0 %v3767_v4  ;;  %1079 = vmatmul.bf16.gmra.mxu3 %v3769_v5 }
  0xd5   : > { %1039 = vmatmul.bf16.gmra.mxu1 %v3771_v6 }
  0xe4   : > { %955 = vmatmul.bf16.gmra.mxu0 %v3782_v16  ;;  %1084 = vmatmul.bf16.gmra.mxu3 %v3784_v17 }
  0xe5   : > { %1044 = vmatmul.bf16.gmra.mxu1 %v3786_v19 }
  0xf4   : > { %960 = vmatmul.bf16.gmra.mxu0 %v3797_v35  ;;  %1089 = vmatmul.bf16.gmra.mxu3 %v3799_v36 }
  0xf5   : > { %1049 = vmatmul.bf16.gmra.mxu1 %v3801_v37 }
 0x101   : > { %v926_v46 = vpop.f32.mrf.mxu0 }
 0x102   : > { %v1015_v52 = vpop.f32.mrf.mxu1 }
 0x103   : > { %v1016_v56 = vadd.f32 %v1015_v52, %v926_v46  ;;  %v2883_v46 = vld [vmem:[%s3646_s2 + $0xa4] sm:$0xf] }
 0x104   : > { %965 = vmatmul.bf16.gmra.mxu0 %v3810_v45 }
 0x105   : > { %1054 = vmatmul.bf16.gmra.mxu1 %v3812_v47  ;;  %v1127_v1 = vadd.f32 %v1095_v57, %v1016_v56  ;;  %v3842_v57 = vor.u32 %v2883_v46, %v2650_v48 }
 0x107   : > { %v3817_v55 = vpop.f32.mrf.mxu3 }
 0x109   : > { %v928_v61 = vpop.f32.mrf.mxu0 }
 0x10a   : > { %v1017_v63 = vpop.f32.mrf.mxu1 }
 0x10b   : > { %v1018_v0 = vadd.f32 %v1017_v63, %v928_v61  ;;  %v601_v61 = vld [vmem:[%s3656_s4 + $0x10] sm:$0xff]  }
 0x10c   : > { %v633_v63 = vunpack.c.l.bf16 %v601_v61 }
 0x10d   : > { %v1128_v2 = vadd.f32 %v1096_v62, %v1018_v0  ;;  %v634_v0 = vunpack.c.h.bf16 %v601_v61 }
 0x10e   : > { %v1099_v3 = vmul.f32 1.1, %v633_v63 }
 0x10f   : > { %v3823_v10 = vpop.f32.mrf.mxu3  ;;  %v1159_v11 = vpack.c.bf16 %v1128_v2, %v1127_v1  ;;  %v1100_v8 = vmul.f32 1.1, %v634_v0 }
 0x111   : > { %1251 = vmatmul.bf16.vlgmr.msra.gmra.mxu2 %v1159_v11  ;;  %v931_v13 = vpop.f32.mrf.mxu0 }
 0x112   : > { %v1020_v18 = vpop.f32.mrf.mxu1 }
 0x113   : > { %v1021_v26 = vadd.f32 %v1020_v18, %v931_v13  ;;  %v2656_v18 = vld [vmem:[%s3646_s2 + $0xb0] sm:$0xf] }
 0x114   : > { %970 = vmatmul.bf16.gmra.mxu0 %v3825_v12 }
 0x115   : > { %1059 = vmatmul.bf16.gmra.mxu1 %v3827_v14  ;;  %v1129_v38 = vadd.f32 %v1097_v27, %v1021_v26  ;;  %v2658_v26 = vld [vmem:[%s3646_s2 + $0xb8] sm:$0xf0]  ;;  %s4335_s2 = scalar_lea.vmem [#allocation11], %s2560_s19 }
 0x116   : > { %s2372_s18 = sshll.u32 %s4335_s2, 4  ;;  %s2373_s18 = int_to_ptr.vmem [resolvable:$true] %s2372_s18 }
 0x117   : > { %v3832_v25 = vpop.f32.mrf.mxu3 }
 0x119   : > { %v933_v28 = vpop.f32.mrf.mxu0 }
 0x11a   : > { %v1022_v30 = vpop.f32.mrf.mxu1 }
 0x11b   : > { %v1023_v34 = vadd.f32 %v1022_v30, %v933_v28 }
 0x11d   : > { %v1130_v39 = vadd.f32 %v1098_v29, %v1023_v34  ;;  %v3855_v29 = vor.u32 %v2886_v20, %v2656_v18  ;;  %v3857_v34 = vor.u32 %v2885_v21, %v2658_v26  ;;  %v621_v18 = vld [vmem:[%s3656_s4 + $0x60] sm:$0xff]  }
 0x11f   : > { %v3838_v52 = vpop.f32.mrf.mxu3  ;;  %v1160_v53 = vpack.c.bf16 %v1130_v39, %v1129_v38  ;;  %v603_v38 = vld [vmem:[%s3656_s4 + $0x18] sm:$0xff]  }
 0x120   : > { %v635_v43 = vunpack.c.l.bf16 %v603_v38  ;;  %v636_v44 = vunpack.c.h.bf16 %v603_v38  ;;  %v653_v38 = vunpack.c.l.bf16 %v621_v18 }
 0x121   : > { %1256 = vmatmul.bf16.gmra.mxu2 %v1160_v53  ;;  %v936_v56 = vpop.f32.mrf.mxu0 }
 0x122   : > { %v1025_v62 = vpop.f32.mrf.mxu1  ;;  %v1101_v53 = vmul.f32 1.1, %v635_v43  ;;  %v1102_v61 = vmul.f32 1.1, %v636_v44  ;;  %v654_v43 = vunpack.c.h.bf16 %v621_v18 }
 0x123   : > { %v1026_v2 = vadd.f32 %v1025_v62, %v936_v56 }
 0x124   : > { %975 = vmatmul.bf16.gmra.mxu0 %v3840_v54 }
 0x125   : > { %1064 = vmatmul.bf16.gmra.mxu1 %v3842_v57  ;;  %v1131_v13 = vadd.f32 %v1099_v3, %v1026_v2 }
 0x127   : > { %v3847_v1 = vpop.f32.mrf.mxu3 }
 0x129   : > { %v938_v7 = vpop.f32.mrf.mxu0 }
 0x12a   : > { %v1027_v9 = vpop.f32.mrf.mxu1 }
 0x12b   : > { %v1028_v11 = vadd.f32 %v1027_v9, %v938_v7  ;;  %v605_v9 = vld [vmem:[%s3656_s4 + $0x20] sm:$0xff]  }
 0x12d   : > { %v1132_v15 = vadd.f32 %v1100_v8, %v1028_v11 }
 0x12f   : > { %v3853_v27 = vpop.f32.mrf.mxu3  ;;  %v1161_v28 = vpack.c.bf16 %v1132_v15, %v1131_v13  ;;  %v637_v13 = vunpack.c.l.bf16 %v605_v9  ;;  %v638_v15 = vunpack.c.h.bf16 %v605_v9 }
 0x131   : > { %1261 = vmatmul.bf16.gmra.mxu2 %v1161_v28  ;;  %v941_v30 = vpop.f32.mrf.mxu0  ;;  %v1103_v26 = vmul.f32 1.1, %v637_v13 }
 0x132   : > { %v1030_v39 = vpop.f32.mrf.mxu1 }
 0x133   : > { %v1031_v48 = vadd.f32 %v1030_v39, %v941_v30  ;;  %v1104_v30 = vmul.f32 1.1, %v638_v15 }
 0x134   : > { %980 = vmatmul.bf16.gmra.mxu0 %v3855_v29 }
 0x135   : > { %1069 = vmatmul.bf16.gmra.mxu1 %v3857_v34  ;;  %v1133_v0 = vadd.f32 %v1101_v53, %v1031_v48 }
 0x137   : > { %v3862_v46 = vpop.f32.mrf.mxu3 }
 0x139   : > { %v943_v56 = vpop.f32.mrf.mxu0 }
 0x13a   : > { %v1032_v62 = vpop.f32.mrf.mxu1 }
 0x13b   : > { %v1033_v63 = vadd.f32 %v1032_v62, %v943_v56  ;;  %v1120_v62 = vmul.f32 1.1, %v654_v43 }
 0x13d   : > { %v1134_v2 = vadd.f32 %v1102_v61, %v1033_v63  ;;  %v1119_v61 = vmul.f32 1.1, %v653_v38 }
 0x13f   : > { %v3864_v3 = vpop.f32.mrf.mxu3  ;;  %v1162_v7 = vpack.c.bf16 %v1134_v2, %v1133_v0 }
 0x141   : > { %1266 = vmatmul.bf16.gmra.mxu2 %v1162_v7  ;;  %v946_v8 = vpop.f32.mrf.mxu0 }
 0x142   : > { %v1035_v11 = vpop.f32.mrf.mxu1 }
 0x143   : > { %v1036_v21 = vadd.f32 %v1035_v11, %v946_v8  ;;  %v607_v11 = vld [vmem:[%s3656_s4 + $0x28] sm:$0xff]  }
 0x144   : > { %v639_v18 = vunpack.c.l.bf16 %v607_v11 }
 0x145   : > { %v1135_v48 = vadd.f32 %v1103_v26, %v1036_v21  ;;  %v623_v21 = vld [vmem:[%s3656_s4 + $0x68] sm:$0xff]  }
 0x147   : > { %v1075_v20 = vpop.f32.mrf.mxu3 }
 0x148   : > { %v1076_v56 = vadd.f32 %v1075_v20, %v3817_v55  ;;  %v1105_v20 = vmul.f32 1.1, %v639_v18 }
 0x149   : > { %v948_v28 = vpop.f32.mrf.mxu0 }
 0x14a   : > { %v1037_v39 = vpop.f32.mrf.mxu1  ;;  %v1151_v8 = vadd.f32 %v1119_v61, %v1076_v56 }
 0x14b   : > { %v1038_v44 = vadd.f32 %v1037_v39, %v948_v28  ;;  %v640_v28 = vunpack.c.h.bf16 %v607_v11  ;;  %v655_v39 = vunpack.c.l.bf16 %v623_v21 }
 0x14d   : > { %v1136_v53 = vadd.f32 %v1104_v30, %v1038_v44  ;;  %v1106_v38 = vmul.f32 1.1, %v640_v28  ;;  %v1121_v61 = vmul.f32 1.1, %v655_v39 }
 0x14f   : > { %v1077_v63 = vpop.f32.mrf.mxu3  ;;  %v1163_v0 = vpack.c.bf16 %v1136_v53, %v1135_v48 }
 0x150   : > { %v1078_v2 = vadd.f32 %v1077_v63, %v3823_v10  ;;  %v656_v10 = vunpack.c.h.bf16 %v623_v21 }
 0x151   : > { %1271 = vmatmul.bf16.gmra.mxu2 %v1163_v0  ;;  %v951_v7 = vpop.f32.mrf.mxu0 }
 0x152   : > { %v1152_v9 = vadd.f32 %v1120_v62, %v1078_v2  ;;  %v1040_v13 = vpop.f32.mrf.mxu1  ;;  %v1122_v62 = vmul.f32 1.1, %v656_v10 }
 0x153   : > { %v1041_v55 = vadd.f32 %v1040_v13, %v951_v7 }
 0x154   : > { %v1171_v15 = vpack.c.bf16 %v1152_v9, %v1151_v8  ;;  %v609_v9 = vld [vmem:[%s3656_s4 + $0x30] sm:$0xff]  }
 0x155   : > { %v1137_v48 = vadd.f32 %v1105_v20, %v1041_v55  ;;  %v641_v28 = vunpack.c.l.bf16 %v609_v9  ;;  %v642_v21 = vunpack.c.h.bf16 %v609_v9 }
 0x156   : > { %1311 = vmatmul.bf16.vlgmr.msra.gmra.mxu3 %v1171_v15  ;;  %v2926_v15 = vld [vmem:[#allocation8 + $0x38] sm:$0xff] }
 0x157   : > { %v1080_v26 = vpop.f32.mrf.mxu3  ;;  %1448 = vmatpush.bf16.msrb.mxu3 %v2926_v15 }
 0x158   : > { %v1081_v56 = vadd.f32 %v1080_v26, %v3832_v25  ;;  %v2925_v25 = vld [vmem:[#allocation8 + $0x30] sm:$0xff] }
 0x159   : > { %v953_v30 = vpop.f32.mrf.mxu0  ;;  %v625_v26 = vld [vmem:[%s3656_s4 + $0x70] sm:$0xff]  }
 0x15a   : > { %v1042_v43 = vpop.f32.mrf.mxu1  ;;  %v1153_v8 = vadd.f32 %v1121_v61, %v1081_v56  ;;  %v657_v39 = vunpack.c.l.bf16 %v625_v26  ;;  %v658_v10 = vunpack.c.h.bf16 %v625_v26 }
 0x15b   : > { %v1043_v44 = vadd.f32 %v1042_v43, %v953_v30  ;;  %1449 = vmatpush.bf16.msrb.mxu3 %v2925_v25  ;;  %v1107_v30 = vmul.f32 1.1, %v641_v28  ;;  %v2922_v28 = vld [vmem:[#allocation8 + $0x18] sm:$0xff] }
 0x15d   : > { %v1138_v53 = vadd.f32 %v1106_v38, %v1043_v44  ;;  %v2924_v44 = vld [vmem:[#allocation8 + $0x28] sm:$0xff] }
 0x15f   : > { %v1082_v63 = vpop.f32.mrf.mxu3  ;;  %v1164_v0 = vpack.c.bf16 %v1138_v53, %v1137_v48  ;;  %1450 = vmatpush.bf16.msrb.mxu3 %v2924_v44  ;;  %v2923_v53 = vld [vmem:[#allocation8 + $0x20] sm:$0xff]  ;;  %v2920_v44 = vld [vmem:[#allocation8 + $0x8] sm:$0xff] }
 0x160   : > { %v1083_v2 = vadd.f32 %v1082_v63, %v3838_v52  ;;  %v1108_v52 = vmul.f32 1.1, %v642_v21  ;;  %v1123_v63 = vmul.f32 1.1, %v657_v39 }
 0x161   : > { %1276 = vmatmul.bf16.gmra.mxu2 %v1164_v0  ;;  %v956_v7 = vpop.f32.mrf.mxu0  ;;  %v1124_v0 = vmul.f32 1.1, %v658_v10 }
 0x162   : > { %v1045_v11 = vpop.f32.mrf.mxu1  ;;  %v1154_v13 = vadd.f32 %v1122_v62, %v1083_v2 }
 0x163   : > { %v1046_v20 = vadd.f32 %v1045_v11, %v956_v7  ;;  %1451 = vmatpush.bf16.msrb.mxu3 %v2923_v53 }
 0x164   : > { %v1172_v18 = vpack.c.bf16 %v1154_v13, %v1153_v8  ;;  %v611_v13 = vld [vmem:[%s3656_s4 + $0x38] sm:$0xff]  }
 0x165   : > { %v1139_v56 = vadd.f32 %v1107_v30, %v1046_v20  ;;  %v643_v25 = vunpack.c.l.bf16 %v611_v13  ;;  %v644_v26 = vunpack.c.h.bf16 %v611_v13  ;;  %v613_v13 = vld [vmem:[%s3656_s4 + $0x40] sm:$0xff]  }
 0x166   : > { %1316 = vmatmul.bf16.gmra.mxu3 %v1172_v18 }
 0x167   : > { %v1085_v55 = vpop.f32.mrf.mxu3  ;;  %1452 = vmatpush.bf16.msrb.mxu3 %v2922_v28 }
 0x168   : > { %v1086_v62 = vadd.f32 %v1085_v55, %v3847_v1  ;;  %v2921_v1 = vld [vmem:[#allocation8 + $0x10] sm:$0xff]  ;;  %v627_v55 = vld [vmem:[%s3656_s4 + $0x78] sm:$0xff]  }
 0x169   : > { %v958_v38 = vpop.f32.mrf.mxu0  ;;  %v659_v39 = vunpack.c.l.bf16 %v627_v55  ;;  %v660_v10 = vunpack.c.h.bf16 %v627_v55 }
 0x16a   : > { %v1047_v43 = vpop.f32.mrf.mxu1  ;;  %v1155_v11 = vadd.f32 %v1123_v63, %v1086_v62 }
 0x16b   : > { %v1048_v48 = vadd.f32 %v1047_v43, %v958_v38  ;;  %1453 = vmatpush.bf16.msrb.mxu3 %v2921_v1  ;;  %v1109_v38 = vmul.f32 1.1, %v643_v25  ;;  %v1125_v62 = vmul.f32 1.1, %v659_v39  ;;  %v1126_v63 = vmul.f32 1.1, %v660_v10 }
 0x16c   : > { %v646_v25 = vunpack.c.h.bf16 %v613_v13  ;;  %v615_v39 = vld [vmem:[%s3656_s4 + $0x48] sm:$0xff]  }
 0x16d   : > { %v1140_v61 = vadd.f32 %v1108_v52, %v1048_v48  ;;  %v1110_v52 = vmul.f32 1.1, %v644_v26 }
 0x16e   : > { %v1112_v55 = vmul.f32 1.1, %v646_v25 }
 0x16f   : > { %v1087_v2 = vpop.f32.mrf.mxu3  ;;  %v1165_v8 = vpack.c.bf16 %v1140_v61, %v1139_v56  ;;  %1454 = vmatpush.bf16.msrb.mxu3 %v2920_v44  ;;  %v647_v44 = vunpack.c.l.bf16 %v615_v39 }
 0x170   : > { %v1088_v7 = vadd.f32 %v1087_v2, %v3853_v27 }
 0x171   : > { %1281 = vmatmul.bf16.gmra.mxu2 %v1165_v8  ;;  %v961_v9 = vpop.f32.mrf.mxu0 }
 0x172   : > { %v1050_v15 = vpop.f32.mrf.mxu1  ;;  %v1156_v18 = vadd.f32 %v1124_v0, %v1088_v7  ;;  %v2919_v0 = vld [vmem:[#allocation8] sm:$0xff] }
 0x173   : > { %v1051_v30 = vadd.f32 %v1050_v15, %v961_v9  ;;  %1455 = vmatpush.bf16.msrb.mxu3 %v2919_v0 }
 0x174   : > { %v1173_v21 = vpack.c.bf16 %v1156_v18, %v1155_v11 }
 0x175   : > { %v1141_v53 = vadd.f32 %v1109_v38, %v1051_v30 }
 0x176   : > { %1321 = vmatmul.bf16.gmra.mxu3 %v1173_v21  ;;  %v645_v21 = vunpack.c.l.bf16 %v613_v13 }
 0x177   : > { %v1090_v20 = vpop.f32.mrf.mxu3 }
 0x178   : > { %v1091_v61 = vadd.f32 %v1090_v20, %v3862_v46  ;;  %v1111_v26 = vmul.f32 1.1, %v645_v21 }
 0x179   : > { %v963_v27 = vpop.f32.mrf.mxu0 }
 0x17a   : > { %v1052_v43 = vpop.f32.mrf.mxu1  ;;  %v1157_v11 = vadd.f32 %v1125_v62, %v1091_v61  ;;  %v1113_v61 = vmul.f32 1.1, %v647_v44 }
 0x17b   : > { %v1053_v48 = vadd.f32 %v1052_v43, %v963_v27 }
 0x17d   : > { %v1142_v56 = vadd.f32 %v1110_v52, %v1053_v48  ;;  %v648_v48 = vunpack.c.h.bf16 %v615_v39 }
 0x17f   : > { %v1092_v2 = vpop.f32.mrf.mxu3  ;;  %v1166_v8 = vpack.c.bf16 %v1142_v56, %v1141_v53  ;;  %v3887_v53 = vld [vmem:[%s4525_s3] ss:$0 sm:$0xff] }
 0x180   : > { %v1093_v7 = vadd.f32 %v1092_v2, %v3864_v3 }
 0x181   : > { %1286 = vmatmul.bf16.gmra.mxu2 %v1166_v8  ;;  %v966_v9 = vpop.f32.mrf.mxu0 }
 0x182   : > { %v1055_v15 = vpop.f32.mrf.mxu1  ;;  %v1158_v18 = vadd.f32 %v1126_v63, %v1093_v7  ;;  %v1114_v63 = vmul.f32 1.1, %v648_v48 }
 0x183   : > { %v1056_v46 = vadd.f32 %v1055_v15, %v966_v9 }
 0x184   : > { %v1174_v28 = vpack.c.bf16 %v1158_v18, %v1157_v11 }
 0x185   : > { %v1143_v38 = vadd.f32 %v1111_v26, %v1056_v46  ;;  %v617_v46 = vld [vmem:[%s3656_s4 + $0x50] sm:$0xff]  }
 0x186   : > { %1326 = vmatmul.bf16.gmra.mxu3 %v1174_v28 }
 0x189   : > { %v968_v1 = vpop.f32.mrf.mxu0 }
 0x18a   : > { %v1057_v20 = vpop.f32.mrf.mxu1 }
 0x18b   : > { %v1058_v30 = vadd.f32 %v1057_v20, %v968_v1  ;;  %v650_v20 = vunpack.c.h.bf16 %v617_v46 }
 0x18d   : > { %v1144_v3 = vadd.f32 %v1112_v55, %v1058_v30  ;;  %v649_v55 = vunpack.c.l.bf16 %v617_v46 }
 0x18f   : > { %v1167_v27 = vpack.c.bf16 %v1144_v3, %v1143_v38  ;;  %v1115_v38 = vmul.f32 1.1, %v649_v55 }
 0x191   : > { %1291 = vmatmul.bf16.gmra.mxu2 %v1167_v27  ;;  %v971_v52 = vpop.f32.mrf.mxu0  ;;  %v1116_v27 = vmul.f32 1.1, %v650_v20 }
 0x192   : > { %v1060_v43 = vpop.f32.mrf.mxu1 }
 0x193   : > { %v1061_v56 = vadd.f32 %v1060_v43, %v971_v52 }
 0x194   : > { %v1252_v10 = vpop.f32.mrf.mxu2 }
 0x195   : > { %v1253_v2 = vadd.f32 %v3887_v53, %v1252_v10  ;;  %v1145_v9 = vadd.f32 %v1113_v61, %v1061_v56 }
 0x197   : > { %v1332_v15 = vmax.f32 %v1253_v2, 0.0 }
 0x199   : > { %v973_v62 = vpop.f32.mrf.mxu0 }
 0x19a   : > { %v1062_v0 = vpop.f32.mrf.mxu1 }
 0x19b   : > { %v1063_v8 = vadd.f32 %v1062_v0, %v973_v62 }
 0x19c   : > { %v1254_v7 = vpop.f32.mrf.mxu2 }
 0x19d   : > { %v1255_v11 = vadd.f32 %v3887_v53, %v1254_v7  ;;  %v1146_v13 = vadd.f32 %v1114_v63, %v1063_v8  ;;  %v619_v8 = vld [vmem:[%s3656_s4 + $0x58] sm:$0xff]   ;;  %s4660_s4 = sld [smem:[#allocation44_spill]] }
 0x19f   : > { %v1333_v18 = vmax.f32 %v1255_v11, 0.0  ;;  %v1168_v28 = vpack.c.bf16 %v1146_v13, %v1145_v9  ;;  %v651_v11 = vunpack.c.l.bf16 %v619_v8  ;;  %v652_v13 = vunpack.c.h.bf16 %v619_v8 }
 0x1a1   : > { %v1364_v21 = vpack.c.bf16 %v1333_v18, %v1332_v15  ;;  %1296 = vmatmul.bf16.gmra.mxu2 %v1168_v28  ;;  %v976_v25 = vpop.f32.mrf.mxu0  ;;  %v1117_v18 = vmul.f32 1.1, %v651_v11 }
 0x1a2   : > { %v1065_v26 = vpop.f32.mrf.mxu1 }
 0x1a3   : > { %1456 = vmatmul.bf16.vlgmr.msrb.gmra.mxu3 %v1364_v21  ;;  %v1066_v30 = vadd.f32 %v1065_v26, %v976_v25  ;;  %v1118_v21 = vmul.f32 1.1, %v652_v13  ;;  %s2371_s14 = scalar_lea.hbm %s4660_s4, %s2935_s8  ;;  %s3325_s22 = scalar_lea.hbm %s4660_s4, 512 }
 0x1a4   : > { %v1257_v1 = vpop.f32.mrf.mxu2  ;;  %s2374_s15 = sshll.u32 %s2371_s14, 4  ;;  %s2375_s15 = int_to_ptr.hbm [resolvable:$true] %s2374_s15 }
 0x1a5   : > { %v1258_v39 = vadd.f32 %v3887_v53, %v1257_v1  ;;  %v1147_v44 = vadd.f32 %v1115_v38, %v1066_v30  ;;  %s3319_s21 = sshra.s32 %s2375_s15, 4  ;;  %s3320_s21 = int_to_ptr.hbm [resolvable:$true] %s3319_s21 }
 0x1a6   : > { %s3321_s13 = scalar_lea.hbm %s3320_s21, 128  ;;  %p3326_p2 = scmp.lt.s32.totalorder %s3320_s21, %s4660_s4 }
 0x1a7   : > { %v1334_v61 = vmax.f32 %v1258_v39, 0.0  ;;  %p3322_p1 = scmp.ne.s32.totalorder %s3320_s21, %s3321_s13  ;;  %p3327_p9 = scmp.lt.s32.totalorder %s3325_s22, %s3321_s13 }
 0x1a9   : > { %v978_v3 = vpop.f32.mrf.mxu0  ;;  %p3323_p4 = pnand %p3322_p1, %p3587_p5  ;;  %p3328_p7 = por %p3327_p9, %p3326_p2 }
 0x1aa   : > { %v1067_v52 = vpop.f32.mrf.mxu1 }
 0x1ab   : > { %v1068_v43 = vadd.f32 %v1067_v52, %v978_v3  ;;  %p3324_p8 = pneg %p3323_p4 }
 0x1ac   : > { %v1259_v10 = vpop.f32.mrf.mxu2 }
 0x1ad   : > { %v1260_v48 = vadd.f32 %v3887_v53, %v1259_v10  ;;  %v1148_v56 = vadd.f32 %v1116_v27, %v1068_v43  ;;  %p3329_p10 = pnand %p3328_p7, %p3324_p8 }
 0x1af   : > { %v1335_v62 = vmax.f32 %v1260_v48, 0.0  ;;  %v1169_v63 = vpack.c.bf16 %v1148_v56, %v1147_v44 }
 0x1b1   : > { %1301 = vmatmul.bf16.gmra.mxu2 %v1169_v63  ;;  %v981_v0 = vpop.f32.mrf.mxu0  ;;  %v1365_v2 = vpack.c.bf16 %v1335_v62, %v1334_v61 }
 0x1b2   : > { %v1070_v7 = vpop.f32.mrf.mxu1 }
 0x1b3   : > { %1461 = vmatmul.bf16.gmra.mxu3 %v1365_v2  ;;  %v1071_v15 = vadd.f32 %v1070_v7, %v981_v0 }
 0x1b4   : > { %v1262_v9 = vpop.f32.mrf.mxu2 }
 0x1b5   : > { %v1263_v46 = vadd.f32 %v3887_v53, %v1262_v9  ;;  %v1149_v55 = vadd.f32 %v1117_v18, %v1071_v15 }
 0x1b7   : > { %v1336_v38 = vmax.f32 %v1263_v46, 0.0 }
 0x1b9   : > { %v983_v28 = vpop.f32.mrf.mxu0 }
 0x1ba   : > { %v1072_v25 = vpop.f32.mrf.mxu1 }
 0x1bb   : > { %v1073_v26 = vadd.f32 %v1072_v25, %v983_v28 }
 0x1bc   : > { %v1264_v1 = vpop.f32.mrf.mxu2 }
 0x1bd   : > { %v1265_v20 = vadd.f32 %v3887_v53, %v1264_v1  ;;  %v1150_v30 = vadd.f32 %v1118_v21, %v1073_v26 }
 0x1bf   : > { %v1337_v3 = vmax.f32 %v1265_v20, 0.0  ;;  %v1170_v27 = vpack.c.bf16 %v1150_v30, %v1149_v55 }
 0x1c1   : > { %1306 = vmatmul.bf16.gmra.mxu2 %v1170_v27  ;;  %v1366_v52 = vpack.c.bf16 %v1337_v3, %v1336_v38 }
 0x1c3   : > { %1466 = vmatmul.bf16.gmra.mxu3 %v1366_v52 }
 0x1c4   : > { %v1267_v39 = vpop.f32.mrf.mxu2 }
 0x1c5   : > { %v1268_v43 = vadd.f32 %v3887_v53, %v1267_v39 }
 0x1c7   : > { %v1338_v48 = vmax.f32 %v1268_v43, 0.0 }
 0x1cc   : > { %v1269_v10 = vpop.f32.mrf.mxu2 }
 0x1cd   : > { %v1270_v44 = vadd.f32 %v3887_v53, %v1269_v10 }
 0x1cf   : > { %v1339_v56 = vmax.f32 %v1270_v44, 0.0 }
 0x1d1   : > { %v1367_v61 = vpack.c.bf16 %v1339_v56, %v1338_v48 }
 0x1d3   : > { %1471 = vmatmul.bf16.gmra.mxu3 %v1367_v61 }
 0x1d4   : > { %v1272_v62 = vpop.f32.mrf.mxu2 }
 0x1d5   : > { %v1273_v0 = vadd.f32 %v3887_v53, %v1272_v62 }
 0x1d7   : > { %v1340_v7 = vmax.f32 %v1273_v0, 0.0 }
 0x1d9   : > { %v3899_v63 = vpop.f32.mrf.mxu3 }
 0x1dc   : > { %v1274_v2 = vpop.f32.mrf.mxu2 }
 0x1dd   : > { %v1275_v8 = vadd.f32 %v3887_v53, %v1274_v2 }
 0x1df   : > { %v1341_v9 = vmax.f32 %v1275_v8, 0.0 }
 0x1e1   : > { %v1368_v11 = vpack.c.bf16 %v1341_v9, %v1340_v7  ;;  %v3903_v13 = vpop.f32.mrf.mxu3 }
 0x1e3   : > { %1476 = vmatmul.bf16.gmra.mxu3 %v1368_v11 }
 0x1e4   : > { %v1277_v15 = vpop.f32.mrf.mxu2 }
 0x1e5   : > { %v1278_v18 = vadd.f32 %v3887_v53, %v1277_v15 }
 0x1e7   : > { %v1342_v46 = vmax.f32 %v1278_v18, 0.0 }
 0x1e9   : > { %v3906_v28 = vpop.f32.mrf.mxu3 }
 0x1ec   : > { %v1279_v21 = vpop.f32.mrf.mxu2 }
 0x1ed   : > { %v1280_v25 = vadd.f32 %v3887_v53, %v1279_v21 }
 0x1ef   : > { %v1343_v26 = vmax.f32 %v1280_v25, 0.0 }
 0x1f1   : > { %v1369_v1 = vpack.c.bf16 %v1343_v26, %v1342_v46  ;;  %v3909_v20 = vpop.f32.mrf.mxu3  ;;  %v3928_v26 = vld [vmem:[%s4527_s5] ss:$0 sm:$0xff] }
 0x1f3   : > { %1481 = vmatmul.bf16.gmra.mxu3 %v1369_v1 }
 0x1f4   : > { %v1282_v55 = vpop.f32.mrf.mxu2 }
 0x1f5   : > { %v1283_v30 = vadd.f32 %v3887_v53, %v1282_v55 }
 0x1f7   : > { %v1344_v27 = vmax.f32 %v1283_v30, 0.0 }
 0x1f9   : > { %v3913_v39 = vpop.f32.mrf.mxu3 }
 0x1fc   : > { %v1284_v38 = vpop.f32.mrf.mxu2 }
 0x1fd   : > { %v1285_v3 = vadd.f32 %v3887_v53, %v1284_v38 }
 0x1ff   : > { %v1345_v52 = vmax.f32 %v1285_v3, 0.0 }
 0x201   : > { %v1370_v43 = vpack.c.bf16 %v1345_v52, %v1344_v27  ;;  %v3915_v44 = vpop.f32.mrf.mxu3  ;;  %v3935_v27 = vld [vmem:[%s4528_s6] ss:$0 sm:$0xff] }
 0x203   : > { %1486 = vmatmul.bf16.gmra.mxu3 %v1370_v43 }
 0x204   : > { %v1287_v10 = vpop.f32.mrf.mxu2 }
 0x205   : > { %v1288_v48 = vadd.f32 %v3887_v53, %v1287_v10 }
 0x207   : > { %v1346_v62 = vmax.f32 %v1288_v48, 0.0 }
 0x209   : > { %v3919_v8 = vpop.f32.mrf.mxu3 }
 0x20c   : > { %v1289_v56 = vpop.f32.mrf.mxu2 }
 0x20d   : > { %v1290_v61 = vadd.f32 %v3887_v53, %v1289_v56 }
 0x20f   : > { %v1347_v0 = vmax.f32 %v1290_v61, 0.0 }
 0x211   : > { %v1371_v2 = vpack.c.bf16 %v1347_v0, %v1346_v62  ;;  %v3923_v18 = vpop.f32.mrf.mxu3  ;;  %v3943_v0 = vld [vmem:[%s4529_s7] ss:$0 sm:$0xff] }
 0x213   : > { %1491 = vmatmul.bf16.gmra.mxu3 %v1371_v2 }
 0x214   : > { %v1292_v7 = vpop.f32.mrf.mxu2 }
 0x215   : > { %v1293_v9 = vadd.f32 %v3887_v53, %v1292_v7 }
 0x217   : > { %v1348_v21 = vmax.f32 %v1293_v9, 0.0 }
 0x21c   : > { %v1294_v11 = vpop.f32.mrf.mxu2 }
 0x21d   : > { %v1295_v15 = vadd.f32 %v3887_v53, %v1294_v11 }
 0x21f   : > { %v1349_v25 = vmax.f32 %v1295_v15, 0.0 }
 0x221   : > { %v1372_v46 = vpack.c.bf16 %v1349_v25, %v1348_v21 }
 0x223   : > { %1496 = vmatmul.bf16.gmra.mxu3 %v1372_v46 }
 0x224   : > { %v1297_v1 = vpop.f32.mrf.mxu2 }
 0x225   : > { %v1298_v38 = vadd.f32 %v3887_v53, %v1297_v1 }
 0x226   : > { %v1457_v55 = vpop.f32.mrf.mxu3 }
 0x227   : > { %v1458_v30 = vadd.f32 %v3928_v26, %v1457_v55  ;;  %v1350_v48 = vmax.f32 %v1298_v38, 0.0 }
 0x229   : > { %v1537_v3 = vmax.f32 %v1458_v30, 0.0 }
 0x22b   : > { %v1573_v56 = vmul.f32 %v3935_v27, %v1537_v3 }
 0x22c   : > { %v1299_v52 = vpop.f32.mrf.mxu2 }
 0x22d   : > { %v1300_v43 = vadd.f32 %v3887_v53, %v1299_v52  ;;  %v3947_v11 = vadd.f32 %v3943_v0, %v1573_v56 }
 0x22e   : > { %v1459_v10 = vpop.f32.mrf.mxu3 }
 0x22f   : > { %v1351_v61 = vmax.f32 %v1300_v43, 0.0  ;;  %v1460_v62 = vadd.f32 %v3928_v26, %v1459_v10  ;;  %v4547_v1 = vmax.f32 %v3947_v11, 0.0 }
 0x231   : > { %v1538_v2 = vmax.f32 %v1460_v62, 0.0  ;;  %v1373_v7 = vpack.c.bf16 %v1351_v61, %v1350_v48 }
 0x233   : > { %v1574_v9 = vmul.f32 %v3935_v27, %v1538_v2  ;;  %1501 = vmatmul.bf16.gmra.mxu3 %v1373_v7 }
 0x234   : > { %v1302_v15 = vpop.f32.mrf.mxu2 }
 0x235   : > { %v3950_v21 = vadd.f32 %v3943_v0, %v1574_v9  ;;  %v1303_v38 = vadd.f32 %v3887_v53, %v1302_v15 }
 0x236   : > { %v1462_v25 = vpop.f32.mrf.mxu3 }
 0x237   : > { %v1463_v46 = vadd.f32 %v3928_v26, %v1462_v25  ;;  %v4548_v55 = vmax.f32 %v3950_v21, 0.0  ;;  %v1352_v48 = vmax.f32 %v1303_v38, 0.0 }
 0x239   : > { %v3959_v30 = vpack.c.bf16 %v4548_v55, %v4547_v1  ;;  %v1539_v3 = vmax.f32 %v1463_v46, 0.0 }
 0x23b   : > { %v1575_v56 = vmul.f32 %v3935_v27, %v1539_v3 }
 0x23c   : > { %v1304_v52 = vpop.f32.mrf.mxu2 }
 0x23d   : > { %v1305_v43 = vadd.f32 %v3887_v53, %v1304_v52  ;;  %v3967_v25 = vadd.f32 %v3943_v0, %v1575_v56 }
 0x23e   : > { %v1464_v10 = vpop.f32.mrf.mxu3 }
 0x23f   : > { %v1353_v61 = vmax.f32 %v1305_v43, 0.0  ;;  %v1465_v62 = vadd.f32 %v3928_v26, %v1464_v10  ;;  %v4551_v3 = vmax.f32 %v3967_v25, 0.0 }
 0x241   : > { %v1540_v2 = vmax.f32 %v1465_v62, 0.0  ;;  %v1374_v7 = vpack.c.bf16 %v1353_v61, %v1352_v48 }
 0x243   : > { %v1576_v9 = vmul.f32 %v3935_v27, %v1540_v2  ;;  %1506 = vmatmul.bf16.gmra.mxu3 %v1374_v7 }
 0x244   : > { %v1307_v15 = vpop.f32.mrf.mxu2 }
 0x245   : > { %v3970_v46 = vadd.f32 %v3943_v0, %v1576_v9  ;;  %v1308_v48 = vadd.f32 %v3887_v53, %v1307_v15 }
 0x246   : > { %v1467_v52 = vpop.f32.mrf.mxu3 }
 0x247   : > { %v1468_v38 = vadd.f32 %v3928_v26, %v1467_v52  ;;  %v4552_v43 = vmax.f32 %v3970_v46, 0.0  ;;  %v1354_v7 = vmax.f32 %v1308_v48, 0.0 }
 0x249   : > { %v3979_v10 = vpack.c.bf16 %v4552_v43, %v4551_v3  ;;  %v1541_v56 = vmax.f32 %v1468_v38, 0.0 }
 0x24b   : > { %v1577_v9 = vmul.f32 %v3935_v27, %v1541_v56 }
 0x24c   : > { %v1309_v61 = vpop.f32.mrf.mxu2 }
 0x24d   : > { %v1310_v62 = vadd.f32 %v3887_v53, %v1309_v61  ;;  %v3987_v3 = vadd.f32 %v3943_v0, %v1577_v9 }
 0x24e   : > { %v1469_v2 = vpop.f32.mrf.mxu3 }
 0x24f   : > { %v1355_v52 = vmax.f32 %v1310_v62, 0.0  ;;  %v1470_v1 = vadd.f32 %v3928_v26, %v1469_v2  ;;  %v4554_v48 = vmax.f32 %v3987_v3, 0.0 }
 0x251   : > { %v1542_v55 = vmax.f32 %v1470_v1, 0.0  ;;  %v1375_v36 = vpack.c.bf16 %v1355_v52, %v1354_v7  ;;  %v1315_v1 = vadd.f32 %v3887_v53, %v3903_v13 }
 0x253   : > { %v1578_v17 = vmul.f32 %v3935_v27, %v1542_v55  ;;  %1511 = vmatmul.bf16.gmra.mxu3 %v1375_v36  ;;  %v1357_v62 = vmax.f32 %v1315_v1, 0.0 }
 0x255   : > { %v3990_v15 = vadd.f32 %v3943_v0, %v1578_v17  ;;  %v1313_v17 = vadd.f32 %v3887_v53, %v3899_v63 }
 0x256   : > { %v1472_v38 = vpop.f32.mrf.mxu3 }
 0x257   : > { %v1473_v61 = vadd.f32 %v3928_v26, %v1472_v38  ;;  %v4555_v56 = vmax.f32 %v3990_v15, 0.0  ;;  %v1356_v7 = vmax.f32 %v1313_v17, 0.0  ;;  %v1320_v17 = vadd.f32 %v3887_v53, %v3909_v20 }
 0x258   : > { %v1323_v20 = vadd.f32 %v3887_v53, %v3913_v39 }
 0x259   : > { %v4001_v36 = vpack.c.bf16 %v4555_v56, %v4554_v48  ;;  %v1543_v55 = vmax.f32 %v1473_v61, 0.0  ;;  %v1376_v43 = vpack.c.bf16 %v1357_v62, %v1356_v7  ;;  %v1359_v62 = vmax.f32 %v1320_v17, 0.0 }
 0x25a   : > { %v1360_v59 = vmax.f32 %v1323_v20, 0.0  ;;  %v1328_v17 = vadd.f32 %v3887_v53, %v3919_v8 }
 0x25b   : > { %v1579_v9 = vmul.f32 %v3935_v27, %v1543_v55 }
 0x25d   : > { %v4009_v5 = vadd.f32 %v3943_v0, %v1579_v9 }
 0x25e   : > { %v1474_v2 = vpop.f32.mrf.mxu3 }
 0x25f   : > { %v1475_v52 = vadd.f32 %v3928_v26, %v1474_v2  ;;  %4613 = vst [vmem:[#allocation30_spill] sm:$0xff] %v4009_v5  ;;  %v4557_v61 = vmax.f32 %v4009_v5, 0.0 }
 0x261   : > { %v1544_v38 = vmax.f32 %v1475_v52, 0.0 }
 0x263   : > { %v1580_v13 = vmul.f32 %v3935_v27, %v1544_v38  ;;  %1516 = vmatmul.bf16.gmra.mxu3 %v1376_v43  ;;  %v1318_v43 = vadd.f32 %v3887_v53, %v3906_v28  ;;  %v1325_v38 = vadd.f32 %v3887_v53, %v3915_v44  ;;  %v1330_v28 = vadd.f32 %v3887_v53, %v3923_v18 }
 0x265   : > { %v4012_v48 = vadd.f32 %v3943_v0, %v1580_v13  ;;  %v1358_v7 = vmax.f32 %v1318_v43, 0.0  ;;  %v1361_v13 = vmax.f32 %v1325_v38, 0.0  ;;  %v1363_v43 = vmax.f32 %v1330_v28, 0.0 }
 0x266   : > { %v1477_v63 = vpop.f32.mrf.mxu3 }
 0x267   : > { %v4558_v1 = vmax.f32 %v4012_v48, 0.0  ;;  %v1377_v9 = vpack.c.bf16 %v1359_v62, %v1358_v7  ;;  %v1362_v7 = vmax.f32 %v1328_v17, 0.0 }
 0x269   : > { %v4022_v55 = vpack.c.bf16 %v4558_v1, %v4557_v61  ;;  %v1378_v61 = vpack.c.bf16 %v1361_v13, %v1360_v59 }
 0x26e   : > { %v1479_v2 = vpop.f32.mrf.mxu3 }
 0x26f   : > { %v1480_v17 = vadd.f32 %v3928_v26, %v1479_v2 }
 0x273   : > { %1521 = vmatmul.bf16.gmra.mxu3 %v1377_v9  ;;  %v1379_v9 = vpack.c.bf16 %v1363_v43, %v1362_v7 }
 0x276   : > { %v1482_v52 = vpop.f32.mrf.mxu3 }
 0x277   : > { %v1483_v18 = vadd.f32 %v3928_v26, %v1482_v52 }
 0x27e   : > { %v1484_v56 = vpop.f32.mrf.mxu3 }
 0x27f   : > { %v1485_v20 = vadd.f32 %v3928_v26, %v1484_v56 }
 0x281   : > { %v1548_v43 = vmax.f32 %v1485_v20, 0.0 }
 0x283   : > { %1526 = vmatmul.bf16.gmra.mxu3 %v1378_v61 }
 0x286   : > { %v1487_v1 = vpop.f32.mrf.mxu3 }
 0x287   : > { %v1488_v59 = vadd.f32 %v3928_v26, %v1487_v1  ;;  %v1478_v1 = vadd.f32 %v3928_v26, %v1477_v63 }
 0x289   : > { %v1549_v53 = vmax.f32 %v1488_v59, 0.0  ;;  %v1545_v59 = vmax.f32 %v1478_v1, 0.0 }
 0x28b   : > { %v1585_v56 = vmul.f32 %v3935_v27, %v1549_v53 }
 0x28d   : > { %v4061_v53 = vadd.f32 %v3943_v0, %v1585_v56 }
 0x28e   : > { %v1489_v62 = vpop.f32.mrf.mxu3 }
 0x28f   : > { %v1490_v38 = vadd.f32 %v3928_v26, %v1489_v62  ;;  %v4563_v1 = vmax.f32 %v4061_v53, 0.0 }
 0x291   : > { %v1550_v13 = vmax.f32 %v1490_v38, 0.0  ;;  %v1584_v38 = vmul.f32 %v3935_v27, %v1548_v43 }
 0x293   : > { %1531 = vmatmul.bf16.gmra.mxu3 %v1379_v9  ;;  %v1586_v7 = vmul.f32 %v3935_v27, %v1550_v13  ;;  %v1547_v9 = vmax.f32 %v1483_v18, 0.0  ;;  %v4070_v43 = vadd.f32 %v3943_v0, %v1584_v38 }
 0x295   : > { %v4054_v2 = vadd.f32 %v3943_v0, %v1586_v7  ;;  %v1583_v63 = vmul.f32 %v3935_v27, %v1547_v9  ;;  %v1581_v7 = vmul.f32 %v3935_v27, %v1545_v59 }
 0x296   : > { %v1492_v44 = vpop.f32.mrf.mxu3 }
 0x297   : > { %v1493_v39 = vadd.f32 %v3928_v26, %v1492_v44  ;;  %v4075_v9 = vadd.f32 %v3943_v0, %v1583_v63  ;;  %v4089_v63 = vadd.f32 %v3943_v0, %v1581_v7 }
 0x299   : > { %v1551_v61 = vmax.f32 %v1493_v39, 0.0  ;;  %v1546_v39 = vmax.f32 %v1480_v17, 0.0  ;;  %v4562_v17 = vmax.f32 %v4054_v2, 0.0 }
 0x29b   : > { %v1587_v8 = vmul.f32 %v3935_v27, %v1551_v61  ;;  %v1679_v56 = vpack.c.bf16 %v4562_v17, %v4563_v1 }
 0x29d   : > { %v4047_v52 = vadd.f32 %v3943_v0, %v1587_v8  ;;  %v1582_v8 = vmul.f32 %v3935_v27, %v1546_v39 }
 0x29e   : > { %v1494_v5 = vpop.f32.mrf.mxu3 }
 0x29f   : > { %v1495_v28 = vadd.f32 %v3928_v26, %v1494_v5  ;;  %v4561_v13 = vmax.f32 %v4047_v52, 0.0  ;;  %v4083_v39 = vadd.f32 %v3943_v0, %v1582_v8 }
 0x2a1   : > { %v1552_v62 = vmax.f32 %v1495_v28, 0.0  ;;  %v4566_v8 = vmax.f32 %v4083_v39, 0.0 }
 0x2a3   : > { %v1588_v44 = vmul.f32 %v3935_v27, %v1552_v62 }
 0x2a5   : > { %v4051_v5 = vadd.f32 %v3943_v0, %v1588_v44  ;;  %v4564_v44 = vmax.f32 %v4070_v43, 0.0 }
 0x2a6   : > { %v1497_v61 = vpop.f32.mrf.mxu3 }
 0x2a7   : > { %v1498_v20 = vadd.f32 %v3928_v26, %v1497_v61  ;;  %v4560_v18 = vmax.f32 %v4051_v5, 0.0 }
 0x2a9   : > { %v1680_v28 = vpack.c.bf16 %v4560_v18, %v4561_v13  ;;  %v1553_v62 = vmax.f32 %v1498_v20, 0.0  ;;  %v4565_v20 = vmax.f32 %v4075_v9, 0.0 }
 0x2ab   : > { %1689 = vmatpush.bf16.msrb.mxu0 %v1680_v28  ;;  %v1589_v59 = vmul.f32 %v3935_v27, %v1553_v62  ;;  %v1678_v18 = vpack.c.bf16 %v4564_v44, %v4565_v20  ;;  %v4569_v62 = vmax.f32 %v4089_v63, 0.0 }
 0x2ad   : > { %v1677_v7 = vpack.c.bf16 %v4566_v8, %v4569_v62 }
 0x2ae   : > { %v1499_v38 = vpop.f32.mrf.mxu3 }
 0x2af   : > { %v1500_v61 = vadd.f32 %v3928_v26, %v1499_v38  ;;  %1690 = vmatpush.bf16.msrb.mxu0 %v1679_v56  ;;  %v4099_v56 = vadd.f32 %v3943_v0, %v1589_v59 }
 0x2b1   : > { %v1554_v28 = vmax.f32 %v1500_v61, 0.0  ;;  %4614 = vst [vmem:[#allocation31_spill] sm:$0xff] %v4099_v56 }
 0x2b3   : > { %v1590_v13 = vmul.f32 %v3935_v27, %v1554_v28  ;;  %1691 = vmatpush.bf16.msrb.mxu0 %v1678_v18  ;;  %v4568_v28 = vmax.f32 %v4099_v56, 0.0 }
 0x2b5   : > { %v4106_v38 = vadd.f32 %v3943_v0, %v1590_v13 }
 0x2b6   : > { %v1502_v61 = vpop.f32.mrf.mxu3 }
 0x2b7   : > { %4615 = vst [vmem:[#allocation32_spill] sm:$0xff] %v4106_v38  ;;  %v1503_v17 = vadd.f32 %v3928_v26, %v1502_v61  ;;  %1692 = vmatpush.bf16.msrb.mxu0 %v1677_v7  ;;  %v4567_v18 = vmax.f32 %v4106_v38, 0.0 }
 0x2b9   : > { %v4115_v59 = vpack.c.bf16 %v4567_v18, %v4568_v28  ;;  %v1555_v1 = vmax.f32 %v1503_v17, 0.0 }
 0x2bb   : > { %1693 = vmatpush.bf16.msrb.mxu0 %v4022_v55  ;;  %v1591_v13 = vmul.f32 %v3935_v27, %v1555_v1 }
 0x2bd   : > { %v4124_v8 = vadd.f32 %v3943_v0, %v1591_v13 }
 0x2be   : > { %v1504_v44 = vpop.f32.mrf.mxu3 }
 0x2bf   : > { %v1505_v20 = vadd.f32 %v3928_v26, %v1504_v44  ;;  %1694 = vmatpush.bf16.msrb.mxu0 %v4001_v36  ;;  %4616 = vst [vmem:[#allocation33_spill] sm:$0xff] %v4124_v8  ;;  %v4571_v1 = vmax.f32 %v4124_v8, 0.0 }
 0x2c1   : > { %v1556_v7 = vmax.f32 %v1505_v20, 0.0 }
 0x2c3   : > { %v1592_v61 = vmul.f32 %v3935_v27, %v1556_v7  ;;  %1695 = vmatpush.bf16.msrb.mxu0 %v3979_v10 }
 0x2c5   : > { %v4127_v18 = vadd.f32 %v3943_v0, %v1592_v61 }
 0x2c6   : > { %v1507_v17 = vpop.f32.mrf.mxu3 }
 0x2c7   : > { %4617 = vst [vmem:[#allocation34_spill] sm:$0xff] %v4127_v18  ;;  %v1508_v55 = vadd.f32 %v3928_v26, %v1507_v17  ;;  %1696 = vmatpush.bf16.msrb.mxu0 %v3959_v30  ;;  %v4570_v36 = vmax.f32 %v4127_v18, 0.0 }
 0x2c9   : > { %v4137_v10 = vpack.c.bf16 %v4570_v36, %v4571_v1  ;;  %v1557_v44 = vmax.f32 %v1508_v55, 0.0 }
 0x2ca   : > { %1697 = vmatmul.bf16.vlgmr.msrb.gmra.mxu0 %v3692_v22 }
 0x2cb   : > { %v1593_v13 = vmul.f32 %v3935_v27, %v1557_v44 }
 0x2cd   : > { %v4144_v17 = vadd.f32 %v3943_v0, %v1593_v13 }
 0x2ce   : > { %v1509_v20 = vpop.f32.mrf.mxu3 }
 0x2cf   : > { %v1510_v7 = vadd.f32 %v3928_v26, %v1509_v20  ;;  %4618 = vst [vmem:[#allocation35_spill] sm:$0xff] %v4144_v17  ;;  %v4575_v22 = vmax.f32 %v4144_v17, 0.0 }
 0x2d1   : > { %v1558_v61 = vmax.f32 %v1510_v7, 0.0 }
 0x2d3   : > { %v1594_v30 = vmul.f32 %v3935_v27, %v1558_v61 }
 0x2d5   : > { %v4147_v28 = vadd.f32 %v3943_v0, %v1594_v30 }
 0x2d6   : > { %v1512_v62 = vpop.f32.mrf.mxu3 }
 0x2d7   : > { %4619 = vst [vmem:[#allocation36_spill] sm:$0xff] %v4147_v28  ;;  %v1513_v36 = vadd.f32 %v3928_v26, %v1512_v62  ;;  %v4574_v55 = vmax.f32 %v4147_v28, 0.0 }
 0x2d9   : > { %v4156_v44 = vpack.c.bf16 %v4574_v55, %v4575_v22  ;;  %v1559_v20 = vmax.f32 %v1513_v36, 0.0 }
 0x2da   : > { %1702 = vmatmul.bf16.gmra.mxu0 %v3707_v31 }
 0x2db   : > { %v1595_v7 = vmul.f32 %v3935_v27, %v1559_v20 }
 0x2dd   : > { %v4163_v1 = vadd.f32 %v3943_v0, %v1595_v7 }
 0x2de   : > { %v1514_v13 = vpop.f32.mrf.mxu3 }
 0x2df   : > { %v1515_v61 = vadd.f32 %v3928_v26, %v1514_v13  ;;  %4620 = vst [vmem:[#allocation37_spill] sm:$0xff] %v4163_v1  ;;  %v4578_v55 = vmax.f32 %v4163_v1, 0.0 }
 0x2e1   : > { %v1560_v30 = vmax.f32 %v1515_v61, 0.0 }
 0x2e3   : > { %v1596_v62 = vmul.f32 %v3935_v27, %v1560_v30 }
 0x2e5   : > { %v4166_v17 = vadd.f32 %v3943_v0, %v1596_v62 }
 0x2e6   : > { %v1517_v28 = vpop.f32.mrf.mxu3 }
 0x2e7   : > { %4621 = vst [vmem:[#allocation38_spill] sm:$0xff] %v4166_v17  ;;  %v4577_v31 = vmax.f32 %v4166_v17, 0.0 }
 0x2e9   : > { %v1684_v36 = vpack.c.bf16 %v4577_v31, %v4578_v55 }
 0x2ea   : > { %1707 = vmatmul.bf16.gmra.mxu0 %v3722_v40 }
 0x2ee   : > { %v1519_v20 = vpop.f32.mrf.mxu3 }
 0x2f6   : > { %v1522_v13 = vpop.f32.mrf.mxu3 }
 0x2fa   : > { %1712 = vmatmul.bf16.gmra.mxu0 %v3737_v49  ;;  %v1523_v49 = vadd.f32 %v3928_v26, %v1522_v13 }
 0x2fe   : > { %v1524_v7 = vpop.f32.mrf.mxu3 }
 0x2ff   : > { %v1525_v40 = vadd.f32 %v3928_v26, %v1524_v7 }
 0x301   : > { %v1564_v56 = vmax.f32 %v1525_v40, 0.0 }
 0x306   : > { %v1527_v61 = vpop.f32.mrf.mxu3 }
 0x307   : > { %v1528_v31 = vadd.f32 %v3928_v26, %v1527_v61  ;;  %v1518_v61 = vadd.f32 %v3928_v26, %v1517_v28 }
 0x309   : > { %v1565_v8 = vmax.f32 %v1528_v31, 0.0 }
 0x30a   : > { %1717 = vmatmul.bf16.gmra.mxu0 %v3752_v58 }
 0x30b   : > { %v1601_v7 = vmul.f32 %v3935_v27, %v1565_v8 }
 0x30e   : > { %v1529_v30 = vpop.f32.mrf.mxu3 }
 0x30f   : > { %v1530_v18 = vadd.f32 %v3928_v26, %v1529_v30 }
 0x311   : > { %v1566_v17 = vmax.f32 %v1530_v18, 0.0 }
 0x313   : > { %v1602_v30 = vmul.f32 %v3935_v27, %v1566_v17  ;;  %v4204_v17 = vadd.f32 %v3943_v0, %v1601_v7 }
 0x316   : > { %v1532_v62 = vpop.f32.mrf.mxu3 }
 0x317   : > { %v1533_v22 = vadd.f32 %v3928_v26, %v1532_v62  ;;  %v1520_v62 = vadd.f32 %v3928_v26, %v1519_v20  ;;  %v4198_v20 = vadd.f32 %v3943_v0, %v1602_v30  ;;  %v1669_v30 = vmax.f32 %v4204_v17, 0.0 }
 0x319   : > { %v1567_v55 = vmax.f32 %v1533_v22, 0.0  ;;  %v1563_v22 = vmax.f32 %v1523_v49, 0.0  ;;  %v1562_v31 = vmax.f32 %v1520_v62, 0.0  ;;  %v1670_v49 = vmax.f32 %v4198_v20, 0.0 }
 0x31a   : > { %1722 = vmatmul.bf16.gmra.mxu0 %v3767_v4 }
 0x31b   : > { %v1603_v58 = vmul.f32 %v3935_v27, %v1567_v55  ;;  %v1600_v55 = vmul.f32 %v3935_v27, %v1564_v56  ;;  %v1598_v40 = vmul.f32 %v3935_v27, %v1562_v31 }
 0x31d   : > { %v4191_v13 = vadd.f32 %v3943_v0, %v1603_v58  ;;  %v4213_v58 = vadd.f32 %v3943_v0, %v1600_v55  ;;  %v4227_v7 = vadd.f32 %v3943_v0, %v1598_v40 }
 0x31e   : > { %v1534_v1 = vpop.f32.mrf.mxu3 }
 0x31f   : > { %v1535_v38 = vadd.f32 %v3928_v26, %v1534_v1  ;;  %v1599_v26 = vmul.f32 %v3935_v27, %v1563_v22  ;;  %v1671_v28 = vmax.f32 %v4191_v13, 0.0  ;;  %v1668_v22 = vmax.f32 %v4213_v58, 0.0 }
 0x320   : > { %v1666_v31 = vmax.f32 %v4227_v7, 0.0 }
 0x321   : > { %v1568_v4 = vmax.f32 %v1535_v38, 0.0  ;;  %v1561_v38 = vmax.f32 %v1518_v61, 0.0  ;;  %v1687_v61 = vpack.c.bf16 %v1670_v49, %v1669_v30 }
 0x323   : > { %v1604_v18 = vmul.f32 %v3935_v27, %v1568_v4  ;;  %v1597_v62 = vmul.f32 %v3935_v27, %v1561_v38  ;;  %v4219_v4 = vadd.f32 %v3943_v0, %v1599_v26  ;;  %v4622_v26 = vmax.f32 %v3950_v21, 0.0 }
 0x324   : > { %v4624_v21 = vmax.f32 %v3970_v46, 0.0  ;;  %v4627_v46 = vmax.f32 %v3987_v3, 0.0 }
 0x325   : > { %v4195_v1 = vadd.f32 %v3943_v0, %v1604_v18  ;;  %v4231_v27 = vadd.f32 %v3943_v0, %v1597_v62  ;;  %v2933_v0 = vld [vmem:[#allocation10 + $0x30] sm:$0xff]  ;;  %v1868_v40 = vmul.f32 1.2, %v4622_v26 }
 0x327   : > { %v1672_v8 = vmax.f32 %v4195_v1, 0.0  ;;  %v1665_v55 = vmax.f32 %v4231_v27, 0.0 }
 0x329   : > { %v1688_v56 = vpack.c.bf16 %v1672_v8, %v1671_v28  ;;  %v1685_v38 = vpack.c.bf16 %v1666_v31, %v1665_v55 }
 0x32a   : > { %1727 = vmatmul.bf16.gmra.mxu0 %v3782_v16  ;;  %v1667_v16 = vmax.f32 %v4219_v4, 0.0 }
 0x32b   : > { %1778 = vmatpush.bf16.msrb.mxu1 %v1688_v56  ;;  %v4623_v56 = vmax.f32 %v3947_v11, 0.0  ;;  %v4625_v11 = vmax.f32 %v3967_v25, 0.0 }
 0x32c   : > { %v1686_v18 = vpack.c.bf16 %v1668_v22, %v1667_v16 }
 0x32d   : > { %v1867_v62 = vmul.f32 1.2, %v4623_v56 }
 0x32f   : > { %1779 = vmatpush.bf16.msrb.mxu1 %v1687_v61 }
 0x333   : > { %1780 = vmatpush.bf16.msrb.mxu1 %v1686_v18 }
 0x337   : > { %1781 = vmatpush.bf16.msrb.mxu1 %v1685_v38 }
 0x33a   : > { %1732 = vmatmul.bf16.gmra.mxu0 %v3797_v35  ;;  %v2934_v35 = vld [vmem:[#allocation10 + $0x38] sm:$0xff] }
 0x33b   : > { %1782 = vmatpush.bf16.msrb.mxu1 %v1684_v36  ;;  %2015 = vmatpush.bf16.msrb.mxu2 %v2934_v35 }
 0x33f   : > { %1783 = vmatpush.bf16.msrb.mxu1 %v4156_v44  ;;  %2016 = vmatpush.bf16.msrb.mxu2 %v2933_v0 }
 0x343   : > { %1784 = vmatpush.bf16.msrb.mxu1 %v4137_v10 }
 0x347   : > { %1785 = vmatpush.bf16.msrb.mxu1 %v4115_v59 }
 0x34a   : > { %1786 = vmatmul.bf16.vlgmr.msrb.gmra.mxu1 %v3696_v24  ;;  %1737 = vmatmul.bf16.gmra.mxu0 %v3810_v45  ;;  %v2932_v24 = vld [vmem:[#allocation10 + $0x28] sm:$0xff]  ;;  %v2931_v45 = vld [vmem:[#allocation10 + $0x20] sm:$0xff] }
 0x34b   : > { %2017 = vmatpush.bf16.msrb.mxu2 %v2932_v24  ;;  %v1870_v24 = vmul.f32 1.2, %v4624_v21 }
 0x34f   : > { %2018 = vmatpush.bf16.msrb.mxu2 %v2931_v45 }
 0x35a   : > { %1791 = vmatmul.bf16.gmra.mxu1 %v3711_v33  ;;  %1742 = vmatmul.bf16.gmra.mxu0 %v3825_v12  ;;  %v1698_v33 = vpop.f32.mrf.mxu0 }
 0x362   : > { %v1700_v12 = vpop.f32.mrf.mxu0 }
 0x36a   : > { %1796 = vmatmul.bf16.gmra.mxu1 %v3726_v42  ;;  %1747 = vmatmul.bf16.gmra.mxu0 %v3840_v54  ;;  %v2930_v42 = vld [vmem:[#allocation10 + $0x18] sm:$0xff]  ;;  %v1703_v54 = vpop.f32.mrf.mxu0 }
 0x36b   : > { %2019 = vmatpush.bf16.msrb.mxu2 %v2930_v42 }
 0x37a   : > { %1801 = vmatmul.bf16.gmra.mxu1 %v3741_v51  ;;  %1752 = vmatmul.bf16.gmra.mxu0 %v3855_v29  ;;  %v2929_v51 = vld [vmem:[#allocation10 + $0x10] sm:$0xff]  ;;  %v2927_v29 = vld [vmem:[#allocation10] sm:$0xff] }
 0x37b   : > { %2020 = vmatpush.bf16.msrb.mxu2 %v2929_v51 }
 0x38a   : > { %1806 = vmatmul.bf16.gmra.mxu1 %v3756_v60  ;;  %1757 = vmatmul.bf16.gmra.mxu0 %v3694_v23  ;;  %v2928_v60 = vld [vmem:[#allocation10 + $0x8] sm:$0xff] }
 0x38b   : > { %2021 = vmatpush.bf16.msrb.mxu2 %v2928_v60 }
 0x38f   : > { %2022 = vmatpush.bf16.msrb.mxu2 %v2927_v29 }
 0x39a   : > { %1811 = vmatmul.bf16.gmra.mxu1 %v3771_v6  ;;  %v1705_v6 = vpop.f32.mrf.mxu0  ;;  %1762 = vmatmul.bf16.gmra.mxu0 %v3709_v32 }
 0x3a2   : > { %v1708_v59 = vpop.f32.mrf.mxu0 }
 0x3aa   : > { %1816 = vmatmul.bf16.gmra.mxu1 %v3786_v19  ;;  %v1710_v44 = vpop.f32.mrf.mxu0  ;;  %1767 = vmatmul.bf16.gmra.mxu0 %v3724_v41 }
 0x3b2   : > { %v1713_v36 = vpop.f32.mrf.mxu0 }
 0x3ba   : > { %1821 = vmatmul.bf16.gmra.mxu1 %v3801_v37  ;;  %v1715_v35 = vpop.f32.mrf.mxu0  ;;  %1772 = vmatmul.bf16.gmra.mxu0 %v3739_v50 }
 0x3c2   : > { %v1718_v0 = vpop.f32.mrf.mxu0 }
 0x3c7   : > { %v1787_v10 = vpop.f32.mrf.mxu1 }
 0x3c8   : > { %v1788_v23 = vadd.f32 %v1787_v10, %v1698_v33  ;;  %v1869_v33 = vmul.f32 1.2, %v4625_v11  ;;  %v4626_v10 = vmax.f32 %v3990_v15, 0.0 }
 0x3ca   : > { %1826 = vmatmul.bf16.gmra.mxu1 %v3812_v47  ;;  %v1899_v32 = vadd.f32 %v1867_v62, %v1788_v23  ;;  %v1720_v29 = vpop.f32.mrf.mxu0  ;;  %v1872_v23 = vmul.f32 1.2, %v4626_v10  ;;  %v4634_v10 = vld [vmem:[#allocation27_spill] sm:$0xff] }
 0x3cf   : > { %v1789_v19 = vpop.f32.mrf.mxu1 }
 0x3d0   : > { %v1790_v61 = vadd.f32 %v1789_v19, %v1700_v12  ;;  %v1871_v19 = vmul.f32 1.2, %v4627_v46 }
 0x3d2   : > { %v1900_v18 = vadd.f32 %v1868_v40, %v1790_v61 }
 0x3d4   : > { %v1931_v37 = vpack.c.bf16 %v1900_v18, %v1899_v32  ;;  %v4629_v18 = vld [vmem:[#allocation30_spill] sm:$0xff] }
 0x3d5   : > { %v4630_v15 = vmax.f32 %v4629_v18, 0.0 }
 0x3d6   : > { %2023 = vmatmul.bf16.vlgmr.msrb.gmra.mxu2 %v1931_v37 }
 0x3d7   : > { %v1792_v38 = vpop.f32.mrf.mxu1  ;;  %v1873_v37 = vmul.f32 1.2, %v4630_v15 }
 0x3d8   : > { %v1793_v41 = vadd.f32 %v1792_v38, %v1703_v54  ;;  %v1723_v54 = vpop.f32.mrf.mxu0 }
 0x3da   : > { %1831 = vmatmul.bf16.gmra.mxu1 %v3827_v14  ;;  %v1901_v42 = vadd.f32 %v1869_v33, %v1793_v41 }
 0x3df   : > { %v1794_v47 = vpop.f32.mrf.mxu1 }
 0x3e0   : > { %v1795_v45 = vadd.f32 %v1794_v47, %v1705_v6  ;;  %v1725_v62 = vpop.f32.mrf.mxu0 }
 0x3e2   : > { %v1902_v12 = vadd.f32 %v1870_v24, %v1795_v45  ;;  %v4631_v24 = vld [vmem:[#allocation26_spill] sm:$0xff] }
 0x3e4   : > { %v1932_v51 = vpack.c.bf16 %v1902_v12, %v1901_v42  ;;  %v4633_v42 = vmax.f32 %v4083_v39, 0.0 }
 0x3e6   : > { %2028 = vmatmul.bf16.gmra.mxu2 %v1932_v51  ;;  %v1876_v12 = vmul.f32 1.2, %v4633_v42 }
 0x3e7   : > { %v1797_v60 = vpop.f32.mrf.mxu1 }
 0x3e8   : > { %v1798_v50 = vadd.f32 %v1797_v60, %v1708_v59  ;;  %v4628_v59 = vmax.f32 %v4012_v48, 0.0  ;;  %v1728_v3 = vpop.f32.mrf.mxu0 }
 0x3ea   : > { %1836 = vmatmul.bf16.gmra.mxu1 %v3842_v57  ;;  %v1903_v26 = vadd.f32 %v1871_v19, %v1798_v50  ;;  %v1874_v32 = vmul.f32 1.2, %v4628_v59 }
 0x3ef   : > { %v1799_v14 = vpop.f32.mrf.mxu1 }
 0x3f0   : > { %v1800_v25 = vadd.f32 %v1799_v14, %v1710_v44  ;;  %v1730_v11 = vpop.f32.mrf.mxu0 }
 0x3f2   : > { %v1904_v6 = vadd.f32 %v1872_v23, %v1800_v25 }
 0x3f4   : > { %v1933_v40 = vpack.c.bf16 %v1904_v6, %v1903_v26 }
 0x3f6   : > { %2033 = vmatmul.bf16.gmra.mxu2 %v1933_v40 }
 0x3f7   : > { %v1802_v56 = vpop.f32.mrf.mxu1 }
 0x3f8   : > { %v1803_v61 = vadd.f32 %v1802_v56, %v1713_v36  ;;  %v4632_v36 = vmax.f32 %v4089_v63, 0.0  ;;  %v1733_v50 = vpop.f32.mrf.mxu0 }
 0x3fa   : > { %1841 = vmatmul.bf16.gmra.mxu1 %v3857_v34  ;;  %v1905_v41 = vadd.f32 %v1873_v37, %v1803_v61  ;;  %v1875_v45 = vmul.f32 1.2, %v4632_v36 }
 0x3ff   : > { %v1804_v57 = vpop.f32.mrf.mxu1 }
 0x400   : > { %v1805_v38 = vadd.f32 %v1804_v57, %v1715_v35  ;;  %v1735_v19 = vpop.f32.mrf.mxu0  ;;  %v4637_v57 = vld [vmem:[#allocation28_spill] sm:$0xff] }
 0x402   : > { %v1906_v44 = vadd.f32 %v1874_v32, %v1805_v38 }
 0x404   : > { %v1934_v47 = vpack.c.bf16 %v1906_v44, %v1905_v41 }
 0x406   : > { %2038 = vmatmul.bf16.gmra.mxu2 %v1934_v47  ;;  %v4640_v47 = vld [vmem:[#allocation29_spill] sm:$0xff] }
 0x407   : > { %v1807_v21 = vpop.f32.mrf.mxu1 }
 0x408   : > { %v1808_v33 = vadd.f32 %v1807_v21, %v1718_v0  ;;  %v4635_v0 = vmax.f32 %v4075_v9, 0.0  ;;  %v1738_v61 = vpop.f32.mrf.mxu0  ;;  %v4639_v9 = vmax.f32 %v4054_v2, 0.0 }
 0x40a   : > { %1846 = vmatmul.bf16.gmra.mxu1 %v4631_v24  ;;  %v1907_v51 = vadd.f32 %v1875_v45, %v1808_v33  ;;  %v1877_v25 = vmul.f32 1.2, %v4635_v0 }
 0x40f   : > { %v1809_v34 = vpop.f32.mrf.mxu1 }
 0x410   : > { %v1810_v48 = vadd.f32 %v1809_v34, %v1720_v29  ;;  %v4636_v29 = vmax.f32 %v4070_v43, 0.0  ;;  %v1740_v38 = vpop.f32.mrf.mxu0 }
 0x412   : > { %v1908_v35 = vadd.f32 %v1876_v12, %v1810_v48  ;;  %v1878_v26 = vmul.f32 1.2, %v4636_v29 }
 0x414   : > { %v1935_v60 = vpack.c.bf16 %v1908_v35, %v1907_v51 }
 0x416   : > { %2043 = vmatmul.bf16.gmra.mxu2 %v1935_v60  ;;  %v4643_v60 = vld [vmem:[#allocation31_spill] sm:$0xff] }
 0x417   : > { %v1812_v14 = vpop.f32.mrf.mxu1 }
 0x418   : > { %v1813_v23 = vadd.f32 %v1812_v14, %v1723_v54  ;;  %v4638_v54 = vmax.f32 %v4061_v53, 0.0  ;;  %v1743_v21 = vpop.f32.mrf.mxu0  ;;  %v4644_v14 = vmax.f32 %v4643_v60, 0.0 }
 0x41a   : > { %1851 = vmatmul.bf16.gmra.mxu1 %v4634_v10  ;;  %v1909_v39 = vadd.f32 %v1877_v25, %v1813_v23  ;;  %v1879_v18 = vmul.f32 1.2, %v4638_v54  ;;  %v1883_v10 = vmul.f32 1.2, %v4644_v14  ;;  %v4645_v23 = vld [vmem:[#allocation32_spill] sm:$0xff] }
 0x41f   : > { %v1814_v46 = vpop.f32.mrf.mxu1 }
 0x420   : > { %v1815_v63 = vadd.f32 %v1814_v46, %v1725_v62  ;;  %v1880_v62 = vmul.f32 1.2, %v4639_v9  ;;  %v1745_v12 = vpop.f32.mrf.mxu0  ;;  %v4646_v46 = vmax.f32 %v4645_v23, 0.0 }
 0x422   : > { %v1910_v6 = vadd.f32 %v1878_v26, %v1815_v63  ;;  %v4310_v63 = vld [vmem:[%s4531_s9] ss:$0 sm:$0xff] }
 0x424   : > { %v1936_v40 = vpack.c.bf16 %v1910_v6, %v1909_v39 }
 0x426   : > { %2048 = vmatmul.bf16.gmra.mxu2 %v1936_v40 }
 0x427   : > { %v1817_v56 = vpop.f32.mrf.mxu1 }
 0x428   : > { %v1818_v59 = vadd.f32 %v1817_v56, %v1728_v3  ;;  %v4641_v3 = vmax.f32 %v4047_v52, 0.0  ;;  %v1884_v52 = vmul.f32 1.2, %v4646_v46  ;;  %v1748_v0 = vpop.f32.mrf.mxu0 }
 0x42a   : > { %1856 = vmatmul.bf16.gmra.mxu1 %v4637_v57  ;;  %v1911_v37 = vadd.f32 %v1879_v18, %v1818_v59  ;;  %v1881_v34 = vmul.f32 1.2, %v4641_v3  ;;  %v4647_v59 = vld [vmem:[#allocation33_spill] sm:$0xff] }
 0x42f   : > { %v1819_v32 = vpop.f32.mrf.mxu1 }
 0x430   : > { %v1820_v15 = vadd.f32 %v1819_v32, %v1730_v11  ;;  %v4642_v11 = vmax.f32 %v4051_v5, 0.0  ;;  %v1750_v6 = vpop.f32.mrf.mxu0  ;;  %v4648_v32 = vmax.f32 %v4647_v59, 0.0 }
 0x432   : > { %v1912_v43 = vadd.f32 %v1880_v62, %v1820_v15  ;;  %v1882_v36 = vmul.f32 1.2, %v4642_v11  ;;  %v1885_v54 = vmul.f32 1.2, %v4648_v32  ;;  %v4649_v15 = vld [vmem:[#allocation34_spill] sm:$0xff] }
 0x433   : > { %v4650_v9 = vmax.f32 %v4649_v15, 0.0 }
 0x434   : > { %v1937_v41 = vpack.c.bf16 %v1912_v43, %v1911_v37 }
 0x435   : > { %v1886_v62 = vmul.f32 1.2, %v4650_v9 }
 0x436   : > { %2053 = vmatmul.bf16.gmra.mxu2 %v1937_v41  ;;  %v4326_v41 = vld [vmem:[%s4651_s0] ss:$0 sm:$0xff] }
 0x437   : > { %v1822_v44 = vpop.f32.mrf.mxu1 }
 0x438   : > { %v1823_v24 = vadd.f32 %v1822_v44, %v1733_v50 }
 0x43a   : > { %1861 = vmatmul.bf16.gmra.mxu1 %v4640_v47  ;;  %v1913_v2 = vadd.f32 %v1881_v34, %v1823_v24 }
 0x43f   : > { %v1824_v33 = vpop.f32.mrf.mxu1 }
 0x440   : > { %v1825_v53 = vadd.f32 %v1824_v33, %v1735_v19  ;;  %v1753_v33 = vpop.f32.mrf.mxu0 }
 0x442   : > { %v1914_v45 = vadd.f32 %v1882_v36, %v1825_v53 }
 0x444   : > { %v1938_v48 = vpack.c.bf16 %v1914_v45, %v1913_v2 }
 0x446   : > { %2058 = vmatmul.bf16.gmra.mxu2 %v1938_v48 }
 0x447   : > { %v1827_v42 = vpop.f32.mrf.mxu1 }
 0x448   : > { %v1828_v51 = vadd.f32 %v1827_v42, %v1738_v61  ;;  %v4316_v61 = vld [vmem:[%s4532_s10] ss:$0 sm:$0xff] }
 0x44a   : > { %v1915_v19 = vadd.f32 %v1883_v10, %v1828_v51  ;;  %v1755_v10 = vpop.f32.mrf.mxu0 }
 0x44f   : > { %v1829_v35 = vpop.f32.mrf.mxu1 }
 0x450   : > { %v1830_v50 = vadd.f32 %v1829_v35, %v1740_v38 }
 0x452   : > { %v1916_v25 = vadd.f32 %v1884_v52, %v1830_v50  ;;  %v4652_v50 = vld [vmem:[#allocation35_spill] sm:$0xff]  ;;  %v1758_v9 = vpop.f32.mrf.mxu0 }
 0x453   : > { %v4653_v23 = vmax.f32 %v4652_v50, 0.0 }
 0x454   : > { %v1939_v5 = vpack.c.bf16 %v1916_v25, %v1915_v19  ;;  %v4654_v25 = vld [vmem:[#allocation36_spill] sm:$0xff] }
 0x455   : > { %v1887_v46 = vmul.f32 1.2, %v4653_v23 }
 0x456   : > { %2063 = vmatmul.bf16.gmra.mxu2 %v1939_v5  ;;  %v4655_v5 = vmax.f32 %v4654_v25, 0.0 }
 0x457   : > { %v1832_v29 = vpop.f32.mrf.mxu1 }
 0x458   : > { %v1833_v40 = vadd.f32 %v1832_v29, %v1743_v21  ;;  %v1888_v29 = vmul.f32 1.2, %v4655_v5 }
 0x459   : > { %v2024_v26 = vpop.f32.mrf.mxu2 }
 0x45a   : > { %v2025_v39 = vadd.f32 %v4310_v63, %v2024_v26  ;;  %v1917_v43 = vadd.f32 %v1885_v54, %v1833_v40 }
 0x45c   : > { %v2104_v56 = vmax.f32 %v2025_v39, 0.0 }
 0x45e   : > { %v2140_v38 = vmul.f32 %v4316_v61, %v2104_v56 }
 0x45f   : > { %v1834_v57 = vpop.f32.mrf.mxu1 }
 0x460   : > { %v1835_v18 = vadd.f32 %v1834_v57, %v1745_v12  ;;  %v2176_v3 = vadd.f32 %v4326_v41, %v2140_v38 }
 0x461   : > { %v2026_v37 = vpop.f32.mrf.mxu2 }
 0x462   : > { %v1918_v44 = vadd.f32 %v1886_v62, %v1835_v18  ;;  %v2027_v47 = vadd.f32 %v4310_v63, %v2026_v37  ;;  %v2208_v2 = vmax.f32 %v2176_v3, 0.0  ;;  %v4656_v3 = vld [vmem:[#allocation37_spill] sm:$0xff] }
 0x464   : > { %v2105_v21 = vmax.f32 %v2027_v47, 0.0  ;;  %v1940_v24 = vpack.c.bf16 %v1918_v44, %v1917_v43 }
 0x466   : > { %v2141_v34 = vmul.f32 %v4316_v61, %v2105_v21  ;;  %2068 = vmatmul.bf16.gmra.mxu2 %v1940_v24 }
 0x467   : > { %v1837_v53 = vpop.f32.mrf.mxu1 }
 0x468   : > { %v2177_v11 = vadd.f32 %v4326_v41, %v2141_v34  ;;  %v1838_v35 = vadd.f32 %v1837_v53, %v1748_v0  ;;  %v4657_v34 = vmax.f32 %v4656_v3, 0.0 }
 0x469   : > { %v2029_v36 = vpop.f32.mrf.mxu2 }
 0x46a   : > { %v2209_v45 = vmax.f32 %v2177_v11, 0.0  ;;  %v2030_v48 = vadd.f32 %v4310_v63, %v2029_v36  ;;  %v1919_v39 = vadd.f32 %v1887_v46, %v1838_v35  ;;  %v1889_v53 = vmul.f32 1.2, %v4657_v34 }
 0x46c   : > { %v2939_v42 = vpack.c.bf16 %v2209_v45, %v2208_v2  ;;  %v2304_v12 = vadd.f32 %v2209_v45, %v2208_v2  ;;  %v2106_v51 = vmax.f32 %v2030_v48, 0.0  ;;  %v4658_v2 = vld [vmem:[#allocation38_spill] sm:$0xff] }
 0x46d   : > { %v4659_v45 = vmax.f32 %v4658_v2, 0.0 }
 0x46e   : > { %2940 = vst [vmem:[%s4335_s2] sm:$0xff] %v2939_v42   ;;  %v2142_v60 = vmul.f32 %v4316_v61, %v2106_v51 }
 0x46f   : > { %v1839_v14 = vpop.f32.mrf.mxu1  ;;  %v1890_v48 = vmul.f32 1.2, %v4659_v45  ;;  %v1893_v45 = vmul.f32 1.2, %v1667_v16 }
 0x470   : > { %v2178_v52 = vadd.f32 %v4326_v41, %v2142_v60  ;;  %v1840_v19 = vadd.f32 %v1839_v14, %v1750_v6 }
 0x471   : > { %v2031_v26 = vpop.f32.mrf.mxu2 }
 0x472   : > { %v2210_v40 = vmax.f32 %v2178_v52, 0.0  ;;  %v1920_v56 = vadd.f32 %v1888_v29, %v1840_v19  ;;  %v2032_v0 = vadd.f32 %v4310_v63, %v2031_v26 }
 0x474   : > { %v2305_v57 = vadd.f32 %v2304_v12, %v2210_v40  ;;  %v2107_v59 = vmax.f32 %v2032_v0, 0.0  ;;  %v1941_v32 = vpack.c.bf16 %v1920_v56, %v1919_v39 }
 0x476   : > { %v2143_v54 = vmul.f32 %v4316_v61, %v2107_v59  ;;  %2073 = vmatmul.bf16.gmra.mxu2 %v1941_v32  ;;  %v1891_v59 = vmul.f32 1.2, %v1665_v55 }
 0x477   : > { %v1842_v18 = vpop.f32.mrf.mxu1 }
 0x478   : > { %v2179_v15 = vadd.f32 %v4326_v41, %v2143_v54  ;;  %v1843_v47 = vadd.f32 %v1842_v18, %v1753_v33  ;;  %v1760_v33 = vpop.f32.mrf.mxu0  ;;  %v1892_v18 = vmul.f32 1.2, %v1666_v31 }
 0x479   : > { %v2034_v6 = vpop.f32.mrf.mxu2 }
 0x47a   : > { %v2211_v62 = vmax.f32 %v2179_v15, 0.0  ;;  %v2035_v37 = vadd.f32 %v4310_v63, %v2034_v6  ;;  %v1921_v12 = vadd.f32 %v1889_v53, %v1843_v47 }
 0x47c   : > { %v2944_v43 = vpack.c.bf16 %v2211_v62, %v2210_v40  ;;  %v2306_v38 = vadd.f32 %v2305_v57, %v2211_v62  ;;  %v2108_v44 = vmax.f32 %v2035_v37, 0.0 }
 0x47e   : > { %3016 = vst [vmem:[%s4335_s2 + $0x8] sm:$0xff] %v2944_v43   ;;  %v2144_v21 = vmul.f32 %v4316_v61, %v2108_v44 }
 0x47f   : > { %v1844_v24 = vpop.f32.mrf.mxu1 }
 0x480   : > { %v2180_v11 = vadd.f32 %v4326_v41, %v2144_v21  ;;  %v1845_v36 = vadd.f32 %v1844_v24, %v1755_v10  ;;  %v1763_v40 = vpop.f32.mrf.mxu0 }
 0x481   : > { %v2036_v42 = vpop.f32.mrf.mxu2 }
 0x482   : > { %v2212_v51 = vmax.f32 %v2180_v11, 0.0  ;;  %v1922_v35 = vadd.f32 %v1890_v48, %v1845_v36  ;;  %v2037_v60 = vadd.f32 %v4310_v63, %v2036_v42 }
 0x484   : > { %v2307_v14 = vadd.f32 %v2306_v38, %v2212_v51  ;;  %v2109_v50 = vmax.f32 %v2037_v60, 0.0  ;;  %v1942_v23 = vpack.c.bf16 %v1922_v35, %v1921_v12  ;;  %v1894_v12 = vmul.f32 1.2, %v1668_v22 }
 0x486   : > { %v2145_v46 = vmul.f32 %v4316_v61, %v2109_v50  ;;  %2078 = vmatmul.bf16.gmra.mxu2 %v1942_v23 }
 0x487   : > { %v1847_v52 = vpop.f32.mrf.mxu1 }
 0x488   : > { %v2181_v10 = vadd.f32 %v4326_v41, %v2145_v46  ;;  %v1848_v56 = vadd.f32 %v1847_v52, %v1758_v9  ;;  %v1765_v55 = vpop.f32.mrf.mxu0 }
 0x489   : > { %v2039_v19 = vpop.f32.mrf.mxu2 }
 0x48a   : > { %v2213_v25 = vmax.f32 %v2181_v10, 0.0  ;;  %v2040_v5 = vadd.f32 %v4310_v63, %v2039_v19  ;;  %v1923_v6 = vadd.f32 %v1891_v59, %v1848_v56 }
 0x48c   : > { %v2949_v29 = vpack.c.bf16 %v2213_v25, %v2212_v51  ;;  %v2308_v26 = vadd.f32 %v2307_v14, %v2213_v25  ;;  %v2110_v39 = vmax.f32 %v2040_v5, 0.0 }
 0x48e   : > { %3017 = vst [vmem:[%s4335_s2 + $0x10] sm:$0xff] %v2949_v29   ;;  %v2146_v0 = vmul.f32 %v4316_v61, %v2110_v39 }
 0x48f   : > { %v1849_v57 = vpop.f32.mrf.mxu1 }
 0x490   : > { %v2182_v32 = vadd.f32 %v4326_v41, %v2146_v0  ;;  %v1850_v54 = vadd.f32 %v1849_v57, %v1760_v33  ;;  %v1768_v35 = vpop.f32.mrf.mxu0  ;;  %v1895_v0 = vmul.f32 1.2, %v1669_v30 }
 0x491   : > { %v2041_v15 = vpop.f32.mrf.mxu2 }
 0x492   : > { %v2214_v62 = vmax.f32 %v2182_v32, 0.0  ;;  %v1924_v37 = vadd.f32 %v1892_v18, %v1850_v54  ;;  %v2042_v43 = vadd.f32 %v4310_v63, %v2041_v15  ;;  %v1896_v32 = vmul.f32 1.2, %v1670_v49 }
 0x494   : > { %v2309_v9 = vadd.f32 %v2308_v26, %v2214_v62  ;;  %v2111_v38 = vmax.f32 %v2042_v43, 0.0  ;;  %v1943_v44 = vpack.c.bf16 %v1924_v37, %v1923_v6 }
 0x496   : > { %v2147_v47 = vmul.f32 %v4316_v61, %v2111_v38  ;;  %2083 = vmatmul.bf16.gmra.mxu2 %v1943_v44 }
 0x497   : > { %v1852_v27 = vpop.f32.mrf.mxu1 }
 0x498   : > { %v2183_v21 = vadd.f32 %v4326_v41, %v2147_v47  ;;  %v1853_v11 = vadd.f32 %v1852_v27, %v1763_v40  ;;  %v1770_v25 = vpop.f32.mrf.mxu0 }
 0x499   : > { %v2044_v24 = vpop.f32.mrf.mxu2 }
 0x49a   : > { %v2215_v7 = vmax.f32 %v2183_v21, 0.0  ;;  %v2045_v31 = vadd.f32 %v4310_v63, %v2044_v24  ;;  %v1925_v60 = vadd.f32 %v1893_v45, %v1853_v11 }
 0x49c   : > { %v2954_v3 = vpack.c.bf16 %v2215_v7, %v2214_v62  ;;  %v2310_v34 = vadd.f32 %v2309_v9, %v2215_v7  ;;  %v2112_v53 = vmax.f32 %v2045_v31, 0.0 }
 0x49e   : > { %3018 = vst [vmem:[%s4335_s2 + $0x18] sm:$0xff] %v2954_v3   ;;  %v2148_v36 = vmul.f32 %v4316_v61, %v2112_v53 }
 0x49f   : > { %v1854_v2 = vpop.f32.mrf.mxu1 }
 0x4a0   : > { %v2184_v48 = vadd.f32 %v4326_v41, %v2148_v36  ;;  %v1855_v42 = vadd.f32 %v1854_v2, %v1765_v55  ;;  %v1773_v38 = vpop.f32.mrf.mxu0  ;;  %v1898_v36 = vmul.f32 1.2, %v1672_v8 }
 0x4a1   : > { %v2046_v51 = vpop.f32.mrf.mxu2 }
 0x4a2   : > { %v2216_v33 = vmax.f32 %v2184_v48, 0.0  ;;  %v1926_v14 = vadd.f32 %v1894_v12, %v1855_v42  ;;  %v2047_v50 = vadd.f32 %v4310_v63, %v2046_v51 }
 0x4a4   : > { %v2311_v23 = vadd.f32 %v2310_v34, %v2216_v33  ;;  %v2113_v46 = vmax.f32 %v2047_v50, 0.0  ;;  %v1944_v52 = vpack.c.bf16 %v1926_v14, %v1925_v60  ;;  %v1897_v34 = vmul.f32 1.2, %v1671_v28 }
 0x4a6   : > { %v2149_v4 = vmul.f32 %v4316_v61, %v2113_v46  ;;  %2088 = vmatmul.bf16.gmra.mxu2 %v1944_v52 }
 0x4a7   : > { %v1857_v16 = vpop.f32.mrf.mxu1 }
 0x4a8   : > { %v2185_v10 = vadd.f32 %v4326_v41, %v2149_v4  ;;  %v1858_v39 = vadd.f32 %v1857_v16, %v1768_v35  ;;  %v1775_v31 = vpop.f32.mrf.mxu0 }
 0x4a9   : > { %v2049_v19 = vpop.f32.mrf.mxu2 }
 0x4aa   : > { %v2217_v58 = vmax.f32 %v2185_v10, 0.0  ;;  %v2050_v22 = vadd.f32 %v4310_v63, %v2049_v19  ;;  %v1927_v18 = vadd.f32 %v1895_v0, %v1858_v39 }
 0x4ac   : > { %v2959_v5 = vpack.c.bf16 %v2217_v58, %v2216_v33  ;;  %v2312_v29 = vadd.f32 %v2311_v23, %v2217_v58  ;;  %v2114_v26 = vmax.f32 %v2050_v22, 0.0 }
 0x4ae   : > { %3019 = vst [vmem:[%s4335_s2 + $0x20] sm:$0xff] %v2959_v5   ;;  %v2150_v40 = vmul.f32 %v4316_v61, %v2114_v26 }
 0x4af   : > { %v1859_v56 = vpop.f32.mrf.mxu1 }
 0x4b0   : > { %v2186_v57 = vadd.f32 %v4326_v41, %v2150_v40  ;;  %v1860_v59 = vadd.f32 %v1859_v56, %v1770_v25 }
 0x4b1   : > { %v2051_v54 = vpop.f32.mrf.mxu2 }
 0x4b2   : > { %v2218_v15 = vmax.f32 %v2186_v57, 0.0  ;;  %v1928_v6 = vadd.f32 %v1896_v32, %v1860_v59  ;;  %v2052_v62 = vadd.f32 %v4310_v63, %v2051_v54 }
 0x4b4   : > { %v2313_v37 = vadd.f32 %v2312_v29, %v2218_v15  ;;  %v2115_v43 = vmax.f32 %v2052_v62, 0.0  ;;  %v1945_v9 = vpack.c.bf16 %v1928_v6, %v1927_v18 }
 0x4b6   : > { %v2151_v17 = vmul.f32 %v4316_v61, %v2115_v43  ;;  %2093 = vmatmul.bf16.gmra.mxu2 %v1945_v9 }
 0x4b7   : > { %v1862_v30 = vpop.f32.mrf.mxu1 }
 0x4b8   : > { %v2187_v44 = vadd.f32 %v4326_v41, %v2151_v17  ;;  %v1863_v24 = vadd.f32 %v1862_v30, %v1773_v38 }
 0x4b9   : > { %v2054_v47 = vpop.f32.mrf.mxu2 }
 0x4ba   : > { %v2219_v20 = vmax.f32 %v2187_v44, 0.0  ;;  %v2055_v49 = vadd.f32 %v4310_v63, %v2054_v47  ;;  %v1929_v45 = vadd.f32 %v1897_v34, %v1863_v24 }
 0x4bc   : > { %v2964_v27 = vpack.c.bf16 %v2219_v20, %v2218_v15  ;;  %v2314_v55 = vadd.f32 %v2313_v37, %v2219_v20  ;;  %v2116_v21 = vmax.f32 %v2055_v49, 0.0 }
 0x4be   : > { %3020 = vst [vmem:[%s4335_s2 + $0x28] sm:$0xff] %v2964_v27   ;;  %v2152_v7 = vmul.f32 %v4316_v61, %v2116_v21 }
 0x4bf   : > { %v1864_v3 = vpop.f32.mrf.mxu1 }
 0x4c0   : > { %v2188_v53 = vadd.f32 %v4326_v41, %v2152_v7  ;;  %v1865_v11 = vadd.f32 %v1864_v3, %v1775_v31 }
 0x4c1   : > { %v2056_v2 = vpop.f32.mrf.mxu2 }
 0x4c2   : > { %v2220_v48 = vmax.f32 %v2188_v53, 0.0  ;;  %v1930_v42 = vadd.f32 %v1898_v36, %v1865_v11  ;;  %v2057_v12 = vadd.f32 %v4310_v63, %v2056_v2 }
 0x4c4   : > { %v2315_v51 = vadd.f32 %v2314_v55, %v2220_v48  ;;  %v2117_v35 = vmax.f32 %v2057_v12, 0.0  ;;  %v1946_v60 = vpack.c.bf16 %v1930_v42, %v1929_v45 }
 0x4c6   : > { %v2153_v33 = vmul.f32 %v4316_v61, %v2117_v35  ;;  %2098 = vmatmul.bf16.gmra.mxu2 %v1946_v60 }
 0x4c8   : > { %v2189_v13 = vadd.f32 %v4326_v41, %v2153_v33 }
 0x4c9   : > { %v2059_v28 = vpop.f32.mrf.mxu2 }
 0x4ca   : > { %v2221_v14 = vmax.f32 %v2189_v13, 0.0  ;;  %v2060_v1 = vadd.f32 %v4310_v63, %v2059_v28 }
 0x4cc   : > { %v2969_v8 = vpack.c.bf16 %v2221_v14, %v2220_v48  ;;  %v2316_v50 = vadd.f32 %v2315_v51, %v2221_v14  ;;  %v2118_v23 = vmax.f32 %v2060_v1, 0.0 }
 0x4ce   : > { %3021 = vst [vmem:[%s4335_s2 + $0x30] sm:$0xff] %v2969_v8   ;;  %v2154_v46 = vmul.f32 %v4316_v61, %v2118_v23 }
 0x4d0   : > { %v2190_v52 = vadd.f32 %v4326_v41, %v2154_v46 }
 0x4d1   : > { %v2061_v4 = vpop.f32.mrf.mxu2 }
 0x4d2   : > { %v2222_v16 = vmax.f32 %v2190_v52, 0.0  ;;  %v2062_v10 = vadd.f32 %v4310_v63, %v2061_v4 }
 0x4d4   : > { %v2317_v19 = vadd.f32 %v2316_v50, %v2222_v16  ;;  %v2119_v58 = vmax.f32 %v2062_v10, 0.0 }
 0x4d6   : > { %v2155_v22 = vmul.f32 %v4316_v61, %v2119_v58 }
 0x4d8   : > { %v2191_v25 = vadd.f32 %v4326_v41, %v2155_v22 }
 0x4d9   : > { %v2064_v5 = vpop.f32.mrf.mxu2 }
 0x4da   : > { %v2223_v29 = vmax.f32 %v2191_v25, 0.0  ;;  %v2065_v26 = vadd.f32 %v4310_v63, %v2064_v5 }
 0x4dc   : > { %v2974_v39 = vpack.c.bf16 %v2223_v29, %v2222_v16  ;;  %v4410_v40 = vadd.f32 %v2317_v19, %v2223_v29  ;;  %v2120_v56 = vmax.f32 %v2065_v26, 0.0 }
 0x4de   : > { %3022 = vst [vmem:[%s4335_s2 + $0x38] sm:$0xff] %v2974_v39   ;;  %v2156_v57 = vmul.f32 %v4316_v61, %v2120_v56 }
 0x4e0   : > { %v2192_v54 = vadd.f32 %v4326_v41, %v2156_v57 }
 0x4e1   : > { %v2066_v0 = vpop.f32.mrf.mxu2 }
 0x4e2   : > { %v2067_v59 = vadd.f32 %v4310_v63, %v2066_v0  ;;  %v2224_v62 = vmax.f32 %v2192_v54, 0.0 }
 0x4e4   : > { %v2121_v32 = vmax.f32 %v2067_v59, 0.0 }
 0x4e6   : > { %v2157_v18 = vmul.f32 %v4316_v61, %v2121_v32 }
 0x4e8   : > { %v2193_v15 = vadd.f32 %v4326_v41, %v2157_v18 }
 0x4e9   : > { %v2069_v6 = vpop.f32.mrf.mxu2 }
 0x4ea   : > { %v2225_v37 = vmax.f32 %v2193_v15, 0.0  ;;  %v2070_v43 = vadd.f32 %v4310_v63, %v2069_v6 }
 0x4ec   : > { %v2979_v9 = vpack.c.bf16 %v2225_v37, %v2224_v62  ;;  %v2325_v38 = vadd.f32 %v2225_v37, %v2224_v62  ;;  %v2122_v17 = vmax.f32 %v2070_v43, 0.0 }
 0x4ee   : > { %3023 = vst [vmem:[%s4335_s2 + $0x40] sm:$0xff] %v2979_v9   ;;  %v2158_v30 = vmul.f32 %v4316_v61, %v2122_v17 }
 0x4f0   : > { %v2194_v44 = vadd.f32 %v4326_v41, %v2158_v30 }
 0x4f1   : > { %v2071_v47 = vpop.f32.mrf.mxu2 }
 0x4f2   : > { %v2226_v20 = vmax.f32 %v2194_v44, 0.0  ;;  %v2072_v49 = vadd.f32 %v4310_v63, %v2071_v47 }
 0x4f4   : > { %v2326_v27 = vadd.f32 %v2325_v38, %v2226_v20  ;;  %v2123_v55 = vmax.f32 %v2072_v49, 0.0 }
 0x4f6   : > { %v2159_v21 = vmul.f32 %v4316_v61, %v2123_v55 }
 0x4f8   : > { %v2195_v24 = vadd.f32 %v4326_v41, %v2159_v21 }
 0x4f9   : > { %v2074_v7 = vpop.f32.mrf.mxu2 }
 0x4fa   : > { %v2227_v31 = vmax.f32 %v2195_v24, 0.0  ;;  %v2075_v3 = vadd.f32 %v4310_v63, %v2074_v7 }
 0x4fc   : > { %v2984_v34 = vpack.c.bf16 %v2227_v31, %v2226_v20  ;;  %v4426_v53 = vadd.f32 %v2326_v27, %v2227_v31  ;;  %v2124_v11 = vmax.f32 %v2075_v3, 0.0 }
 0x4fe   : > { %3024 = vst [vmem:[%s4335_s2 + $0x48] sm:$0xff] %v2984_v34   ;;  %v2160_v2 = vmul.f32 %v4316_v61, %v2124_v11 }
 0x500   : > { %v2196_v42 = vadd.f32 %v4326_v41, %v2160_v2 }
 0x501   : > { %v2076_v36 = vpop.f32.mrf.mxu2 }
 0x502   : > { %v2077_v45 = vadd.f32 %v4310_v63, %v2076_v36  ;;  %v2228_v60 = vmax.f32 %v2196_v42, 0.0 }
 0x504   : > { %v2125_v48 = vmax.f32 %v2077_v45, 0.0  ;;  %v2328_v3 = vadd.f32 %v4426_v53, %v2228_v60 }
 0x506   : > { %v2161_v12 = vmul.f32 %v4316_v61, %v2125_v48 }
 0x508   : > { %v2197_v51 = vadd.f32 %v4326_v41, %v2161_v12 }
 0x509   : > { %v2079_v35 = vpop.f32.mrf.mxu2 }
 0x50a   : > { %v2229_v33 = vmax.f32 %v2197_v51, 0.0  ;;  %v2080_v13 = vadd.f32 %v4310_v63, %v2079_v35 }
 0x50c   : > { %v2989_v28 = vpack.c.bf16 %v2229_v33, %v2228_v60  ;;  %v2126_v14 = vmax.f32 %v2080_v13, 0.0  ;;  %v2329_v36 = vadd.f32 %v2328_v3, %v2229_v33  ;;  %v2319_v33 = vrot.slane %v4410_v40, 4 }
 0x50e   : > { %3025 = vst [vmem:[%s4335_s2 + $0x50] sm:$0xff] %v2989_v28   ;;  %v2162_v8 = vmul.f32 %v4316_v61, %v2126_v14 }
 0x510   : > { %v2198_v46 = vadd.f32 %v4326_v41, %v2162_v8 }
 0x511   : > { %v2081_v1 = vpop.f32.mrf.mxu2 }
 0x512   : > { %v2082_v50 = vadd.f32 %v4310_v63, %v2081_v1  ;;  %v2230_v10 = vmax.f32 %v2198_v46, 0.0 }
 0x514   : > { %v2127_v23 = vmax.f32 %v2082_v50, 0.0  ;;  %v2330_v48 = vadd.f32 %v2329_v36, %v2230_v10 }
 0x516   : > { %v2163_v52 = vmul.f32 %v4316_v61, %v2127_v23 }
 0x518   : > { %v2199_v4 = vadd.f32 %v4326_v41, %v2163_v52 }
 0x519   : > { %v2084_v16 = vpop.f32.mrf.mxu2 }
 0x51a   : > { %v2231_v19 = vmax.f32 %v2199_v4, 0.0  ;;  %v2085_v58 = vadd.f32 %v4310_v63, %v2084_v16  ;;  %v2320_v4 = vadd.f32 %v2319_v33, %v4410_v40 }
 0x51c   : > { %v2994_v22 = vpack.c.bf16 %v2231_v19, %v2230_v10  ;;  %v2128_v25 = vmax.f32 %v2085_v58, 0.0  ;;  %v2331_v35 = vadd.f32 %v2330_v48, %v2231_v19 }
 0x51e   : > { %3026 = vst [vmem:[%s4335_s2 + $0x58] sm:$0xff] %v2994_v22   ;;  %v2164_v29 = vmul.f32 %v4316_v61, %v2128_v25 }
 0x520   : > { %v2200_v56 = vadd.f32 %v4326_v41, %v2164_v29 }
 0x521   : > { %v2086_v5 = vpop.f32.mrf.mxu2 }
 0x522   : > { %v2087_v26 = vadd.f32 %v4310_v63, %v2086_v5  ;;  %v2232_v32 = vmax.f32 %v2200_v56, 0.0 }
 0x524   : > { %v2129_v39 = vmax.f32 %v2087_v26, 0.0  ;;  %v2332_v14 = vadd.f32 %v2331_v35, %v2232_v32 }
 0x526   : > { %v2165_v0 = vmul.f32 %v4316_v61, %v2129_v39 }
 0x528   : > { %v2201_v57 = vadd.f32 %v4326_v41, %v2165_v0 }
 0x529   : > { %v2089_v59 = vpop.f32.mrf.mxu2 }
 0x52a   : > { %v2233_v54 = vmax.f32 %v2201_v57, 0.0  ;;  %v2090_v18 = vadd.f32 %v4310_v63, %v2089_v59 }
 0x52c   : > { %v2999_v15 = vpack.c.bf16 %v2233_v54, %v2232_v32  ;;  %v2130_v6 = vmax.f32 %v2090_v18, 0.0  ;;  %v2333_v60 = vadd.f32 %v2332_v14, %v2233_v54 }
 0x52e   : > { %3027 = vst [vmem:[%s4335_s2 + $0x60] sm:$0xff] %v2999_v15   ;;  %v2166_v37 = vmul.f32 %v4316_v61, %v2130_v6 }
 0x530   : > { %v2202_v38 = vadd.f32 %v4326_v41, %v2166_v37 }
 0x531   : > { %v2091_v62 = vpop.f32.mrf.mxu2 }
 0x532   : > { %v2092_v43 = vadd.f32 %v4310_v63, %v2091_v62  ;;  %v2234_v47 = vmax.f32 %v2202_v38, 0.0 }
 0x534   : > { %v2131_v9 = vmax.f32 %v2092_v43, 0.0  ;;  %v2334_v8 = vadd.f32 %v2333_v60, %v2234_v47 }
 0x536   : > { %v2167_v17 = vmul.f32 %v4316_v61, %v2131_v9 }
 0x538   : > { %v2203_v30 = vadd.f32 %v4326_v41, %v2167_v17 }
 0x539   : > { %v2094_v44 = vpop.f32.mrf.mxu2 }
 0x53a   : > { %v2235_v20 = vmax.f32 %v2203_v30, 0.0  ;;  %v2095_v49 = vadd.f32 %v4310_v63, %v2094_v44 }
 0x53c   : > { %v3004_v27 = vpack.c.bf16 %v2235_v20, %v2234_v47  ;;  %v2132_v55 = vmax.f32 %v2095_v49, 0.0  ;;  %v2335_v46 = vadd.f32 %v2334_v8, %v2235_v20 }
 0x53e   : > { %3028 = vst [vmem:[%s4335_s2 + $0x68] sm:$0xff] %v3004_v27   ;;  %v2168_v24 = vmul.f32 %v4316_v61, %v2132_v55 }
 0x540   : > { %v2204_v34 = vadd.f32 %v4326_v41, %v2168_v24 }
 0x541   : > { %v2096_v21 = vpop.f32.mrf.mxu2 }
 0x542   : > { %v2097_v7 = vadd.f32 %v4310_v63, %v2096_v21  ;;  %v2236_v42 = vmax.f32 %v2204_v34, 0.0 }
 0x544   : > { %v2133_v31 = vmax.f32 %v2097_v7, 0.0  ;;  %v2336_v16 = vadd.f32 %v2335_v46, %v2236_v42 }
 0x546   : > { %v2169_v11 = vmul.f32 %v4316_v61, %v2133_v31 }
 0x548   : > { %v2205_v2 = vadd.f32 %v4326_v41, %v2169_v11 }
 0x549   : > { %v2099_v45 = vpop.f32.mrf.mxu2 }
 0x54a   : > { %v2237_v12 = vmax.f32 %v2205_v2, 0.0  ;;  %v2100_v51 = vadd.f32 %v4310_v63, %v2099_v45 }
 0x54c   : > { %v3009_v13 = vpack.c.bf16 %v2237_v12, %v2236_v42  ;;  %v2134_v28 = vmax.f32 %v2100_v51, 0.0  ;;  %v2337_v58 = vadd.f32 %v2336_v16, %v2237_v12 }
 0x54e   : > { %3029 = vst [vmem:[%s4335_s2 + $0x70] sm:$0xff] %v3009_v13   ;;  %v2170_v53 = vmul.f32 %v4316_v61, %v2134_v28 }
 0x550   : > { %v2206_v50 = vadd.f32 %v4326_v41, %v2170_v53 }
 0x551   : > { %v2101_v1 = vpop.f32.mrf.mxu2 }
 0x552   : > { %v2102_v23 = vadd.f32 %v4310_v63, %v2101_v1  ;;  %v2238_v10 = vmax.f32 %v2206_v50, 0.0  ;;  %v2321_v63 = vrot.slane %v2320_v4, 2 }
 0x554   : > { %v2135_v52 = vmax.f32 %v2102_v23, 0.0  ;;  %v2338_v25 = vadd.f32 %v2337_v58, %v2238_v10  ;;  %v2322_v40 = vadd.f32 %v2321_v63, %v2320_v4 }
 0x556   : > { %v2171_v19 = vmul.f32 %v4316_v61, %v2135_v52 }
 0x558   : > { %v2207_v22 = vadd.f32 %v4326_v41, %v2171_v19 }
 0x55a   : > { %v2239_v5 = vmax.f32 %v2207_v22, 0.0 }
 0x55c   : > { %v3014_v29 = vpack.c.bf16 %v2239_v5, %v2238_v10  ;;  %v2339_v26 = vadd.f32 %v2338_v25, %v2239_v5 }
 0x55e   : > { %3030 = vst [vmem:[%s4335_s2 + $0x78] sm:$0xff] %v3014_v29   ;;  %v2340_v39 = vrot.slane %v2339_v26, 4 }
 0x55f   : > { %3332 = shalt.err (!%p3329_p10)
}
 0x560   : > { %s3424_s30 = smov 64   ;;  %s3425_s20 = smov 4   ;;  %v2341_v61 = vadd.f32 %v2340_v39, %v2339_v26  ;;  %v2323_v41 = vrot.slane %v2322_v40, 1  ;;  %vm2350_vm0 = vcmask 1041409  }
 0x561   : > { %3071 = dma.vmem_to_hbm [thread:$0]  (%p3587_p5), %s2373_s18, 2048, %s2375_s15, %s2355_s24, %s3424_s30, %s3424_s30, %s3425_s20  }
 0x562   : > { %v2342_v56 = vrot.slane %v2341_v61, 2  ;;  %s2565_s0 = sshll.u32 %s3642_s23, 1  ;;  %s2858_s2 = sshll.u32 %s3517_s29, 1  ;;  %v2324_v59 = vadd.f32 %v2323_v41, %v2322_v40 }
 0x563   : > { %s4662_s17 = sld [smem:[#allocation45_spill]]  ;;  %s562_s21 = scalar_lea.vmem [#allocation12], %s2565_s0 }
 0x564   : > { %v2343_v0 = vadd.f32 %v2342_v56, %v2341_v61  ;;  %s2389_s13 = sshll.u32 %s562_s21, 4  ;;  %v2346_v54 = vmul.f32 0.0078125, %v2324_v59  ;;  %s2360_s29 = scalar_lea.sflag [#allocation13], %s3642_s23  ;;  %s2390_s13 = int_to_ptr.vmem [resolvable:$true] %s2389_s13 }
 0x566   : > { %v2344_v57 = vrot.slane %v2343_v0, 1 }
 0x568   : > { %v2345_v32 = vadd.f32 %v2344_v57, %v2343_v0 }
 0x569   : > { %s2387_s14 = scalar_lea.hbm %s4662_s17, %s2858_s2  ;;  %s3353_s22 = scalar_lea.hbm %s4662_s17, 8 }
 0x56a   : > { %s2391_s27 = sshll.u32 %s2387_s14, 4  ;;  %v2347_v18 = vmul.f32 0.0078125, %v2345_v32  ;;  %s2392_s27 = int_to_ptr.hbm [resolvable:$true] %s2391_s27 }
 0x56b   : > { %s3347_s18 = sshra.s32 %s2392_s27, 4  ;;  %s3348_s18 = int_to_ptr.hbm [resolvable:$true] %s3347_s18 }
 0x56c   : > { %v2351_v15 = vsel %vm2350_vm0, %v2347_v18, %v2346_v54  ;;  %s3349_s15 = scalar_lea.hbm %s3348_s18, 2  ;;  %p3354_p0 = scmp.lt.s32.totalorder %s3348_s18, %s4662_s17 }
 0x56d   : > { %2353 = vst [vmem:[%s562_s21] sm:$0x3] %v2351_v15  ;;  %p3350_p11 = scmp.ne.s32.totalorder %s3348_s18, %s3349_s15  ;;  %p3355_p3 = scmp.lt.s32.totalorder %s3353_s22, %s3349_s15 }
 0x56f   : > { %p3351_p12 = pnand %p3350_p11, %p3587_p5  ;;  %p3356_p1 = por %p3355_p3, %p3354_p0 }
 0x571   : > { %p3352_p13 = pneg %p3351_p12 }
 0x573   : > { %p3357_p4 = pnand %p3356_p1, %p3352_p13 }
 0x575   : > { %3360 = shalt.err (!%p3357_p4)
}
 0x576   : > { %3072 = dma.vmem_to_hbm [thread:$0]  (%p3587_p5), %s2390_s13, 32, %s2392_s27, %s2360_s29  }
 0x577 PF: > { %s4663_s23 = sld [smem:[#allocation20_spill]]  ;;  %p3106_p8 = scmp.ge.s32.totalorder %s3415_s28, 2 }
 0x579   : > { %p3093_p2 = pnand %p3106_p8, %p3531_p6 }
 0x57b   : > { %p3094_p9 = pneg %p3093_p2 }
 0x57d   : > { %s2403_s20 = sand.u32 1, %s4663_s23  }
 0x57e   : > { %s2404_s0 = scalar_lea.sflag [#allocation4], %s2403_s20 }
 0x57f   : > { %3394 = dma.done.wait (%p3094_p9), %s2404_s0, 2048  }
 0x580   : > { %3396 = vsyncadd (%p3094_p9), %s2404_s0, 4294965248  ;;  %s2414_s2 = scalar_lea.sflag [#allocation13], %s2403_s20 }
 0x581   : > { %3398 = dma.done.wait (%p3094_p9), %s2414_s2, 32  }
 0x582   : > { %3400 = vsyncadd (%p3094_p9), %s2414_s2, 4294967264  ;;  %s4665_s28 = sld [smem:[#allocation23_spill]]  ;;  %s4668_s25 = smov %s3407_s26 }
 0x583   : > { %s4666_s8 = sld [smem:[#allocation21_spill]] }
 0x584   : > { %s4667_s27 = sld [smem:[#allocation24_spill]] }
 0x588   : > { %p34_p5 = scmp.ge.s32.totalorder %s4665_s28, 6  }
 0x589   : > { %s4669_s26 = smov %s4666_s8 }
 0x58a   :  { %36 = sbr.rel (!%p34_p5) target bundleno = 18 (0x12), region = 155 }
 0x58f   :  { %2420 = vsyncpa [#allocation3], 1 }
 0x590   :  { %2422 = vsyncpa [#allocation3 + $0x1], 1 }
 0x591   :  { %2423 = vsyncpa [#allocation6], 1 }
 0x592   :  { %2425 = vsyncpa [#allocation6 + $0x1], 1 }
 0x593   :  { %2426 = vsyncpa [#allocation9], 1 }
 0x594   :  { %2427 = vsyncpa [#allocation4], 1 }
 0x595   :  { %2429 = vsyncpa [#allocation4 + $0x1], 1 }
 0x596   :  { %2430 = vsyncpa [#allocation13], 1 }
 0x597   :  { %2432 = vsyncpa [#allocation13 + $0x1], 1 }

</bundles_post_ra>
